<compile_context>
chip_gen: v5e
topology: v5e:2x2
jax: 0.10.0
libtpu: 0.0.40
codegen_flags: <defaults>
</compile_context>

<pallas_src>
import jax
import jax.numpy as jnp
import numpy as np
from jax.experimental import pallas as pl
from jax.experimental.pallas import tpu as pltpu


# ----------------------------- Pallas kernels ------------------------------

def conv_bn_relu_pool_kernel(p_ref, w_ref, scale_ref, shift_ref, o_ref):
    """One grid step = `tn` samples.

    p_ref : (tn*800, 32) bf16  im2col patches, row = n*800 + q*200 + p
                               (q = pool quadrant, p = pooled position, K padded to 32)
    w_ref : (32, 32)     bf16  conv weight as (K_padded, C)
    scale_ref, shift_ref : (1, 32) f32   folded BN(eval)+bias affine
    o_ref : (tn, 200, 32) f32  pooled features (rows 196..199 are padding)
    """
    y = jnp.dot(p_ref[...], w_ref[...], preferred_element_type=jnp.float32)
    y = jnp.maximum(y * scale_ref[...] + shift_ref[...], 0.0)      # BN(eval) + ReLU
    tn = o_ref.shape[0]
    for n in range(tn):                                            # static unroll
        base = n * 800
        q01 = jnp.maximum(y[base + 0:base + 200], y[base + 200:base + 400])
        q23 = jnp.maximum(y[base + 400:base + 600], y[base + 600:base + 800])
        o_ref[n] = jnp.maximum(q01, q23)                           # MaxPool2d(2)


def fc_kernel(x_ref, w_ref, b_ref, o_ref):
    """x: (N, 6272) f32, w: (10, 6272) f32 (contract on last dims), b: (1, 10)."""
    o_ref[...] = jax.lax.dot_general(
        x_ref[...], w_ref[...],
        dimension_numbers=(((1,), (1,)), ((), ())),
        preferred_element_type=jnp.float32) + b_ref[...]


# ------------------------------- wrappers ----------------------------------

def conv_bn_relu_pool_forward(patches, w_mat, scale, shift, n, tn):
    grid = n // tn
    return pl.pallas_call(
        conv_bn_relu_pool_kernel,
        out_shape=jax.ShapeDtypeStruct((n, 200, 32), jnp.float32),
        grid=(grid,),
        in_specs=[
            pl.BlockSpec((tn * 800, 32), lambda i: (i, 0)),
            pl.BlockSpec((32, 32), lambda i: (0, 0)),
            pl.BlockSpec((1, 32), lambda i: (0, 0)),
            pl.BlockSpec((1, 32), lambda i: (0, 0)),
        ],
        out_specs=pl.BlockSpec((tn, 200, 32), lambda i: (i, 0, 0)),
        compiler_params=pltpu.CompilerParams(
            dimension_semantics=("parallel",)),
    )(patches, w_mat, scale, shift)


def fc_forward(x, w, b):
    n, f = x.shape
    o = w.shape[0]
    return pl.pallas_call(
        fc_kernel,
        out_shape=jax.ShapeDtypeStruct((n, o), jnp.float32),
        grid=(1,),
        in_specs=[
            pl.BlockSpec((n, f), lambda i: (0, 0)),
            pl.BlockSpec((o, f), lambda i: (0, 0)),
            pl.BlockSpec((1, o), lambda i: (0, 0)),
        ],
        out_specs=pl.BlockSpec((n, o), lambda i: (0, 0)),
    )(x, w, b)


def cnn_forward(x, conv_w, conv_b, gamma, beta, fc_w, fc_b, eps=1e-5, tn=1):
    """x: NCHW [N, 1, 28, 28] float32 (matches the PyTorch module's implied input)."""
    N = x.shape[0]
    assert N % tn == 0

    # --- XLA glue: im2col arranged for in-kernel maxpool ---
    xp = jnp.pad(x, ((0, 0), (0, 0), (2, 2), (2, 2)))                   # (N,1,32,32)
    patches = jnp.stack([xp[:, 0, i:i + 28, j:j + 28]
                         for i in range(5) for j in range(5)], axis=-1)  # (N,28,28,25)
    # (h,w) = (2*ph+dh, 2*pw+dw); quadrant q = 2*dh+dw, pooled position p = 14*ph+pw
    patches = (patches.reshape(N, 14, 2, 14, 2, 25)
               .transpose(0, 2, 4, 1, 3, 5)
               .reshape(N, 4, 196, 25))
    # pad pooled positions 196->200 (sublane aligned) and K 25->32, flatten rows
    patches = jnp.pad(patches, ((0, 0), (0, 0), (0, 4), (0, 7)))
    patches = patches.reshape(N * 800, 32).astype(jnp.bfloat16)

    # conv weight as (K_padded=32, C=32), bf16
    w_mat = jnp.pad(conv_w.reshape(32, 25).T, ((0, 7), (0, 0))).astype(jnp.bfloat16)

    # Fold conv bias + BatchNorm (eval mode, running mean=0, var=1) into per-channel affine.
    scale = (gamma / jnp.sqrt(1.0 + eps)).reshape(1, 32).astype(jnp.float32)
    shift = (beta + conv_b * scale[0]).reshape(1, 32).astype(jnp.float32)

    pooled = conv_bn_relu_pool_forward(patches, w_mat, scale, shift, N, tn)  # (N,200,32)
    feats = pooled[:, :196, :].reshape(N, 196 * 32)                          # (hw, c) order

    # permute fc weight from PyTorch (c, h, w) flatten order to our (hw, c) order;
    # keep (10, 6272) shape and contract on last dims (sublane-padded, not lane-padded).
    fc_w_r = (fc_w.reshape(10, 32, 14, 14)
              .transpose(0, 2, 3, 1)
              .reshape(10, 196 * 32)).astype(jnp.float32)                    # (10, 6272)

    return fc_forward(feats, fc_w_r, fc_b.reshape(1, 10).astype(jnp.float32))


# ----------------------- pure-JAX reference (semantics) ---------------------

def reference_forward(x, conv_w, conv_b, gamma, beta, fc_w, fc_b, eps=1e-5):
    y = jax.lax.conv_general_dilated(
        x, conv_w, window_strides=(1, 1), padding=((2, 2), (2, 2)),
        dimension_numbers=('NCHW', 'OIHW', 'NCHW'))
    y = y + conv_b[None, :, None, None]
    y = gamma[None, :, None, None] * y / jnp.sqrt(1.0 + eps) + beta[None, :, None, None]
    y = jnp.maximum(y, 0.0)
    y = jax.lax.reduce_window(y, -jnp.inf, jax.lax.max,
                              window_dimensions=(1, 1, 2, 2),
                              window_strides=(1, 1, 2, 2), padding='VALID')
    y = y.reshape(x.shape[0], -1)
    return y @ fc_w.T + fc_b


# ---------------------------------- main ------------------------------------

if __name__ == "__main__":
    key = jax.random.PRNGKey(0)
    kx, kcw, kcb, kg, kbt, kfw, kfb = jax.random.split(key, 7)

    N = 2
    x = jax.random.normal(kx, (N, 1, 28, 28), jnp.float32)

    # deterministic synthetic parameters (shapes from the module's __init__)
    conv_w = 0.1 * jax.random.normal(kcw, (32, 1, 5, 5), jnp.float32)
    conv_b = 0.1 * jax.random.normal(kcb, (32,), jnp.float32)
    gamma = 1.0 + 0.1 * jax.random.normal(kg, (32,), jnp.float32)
    beta = 0.1 * jax.random.normal(kbt, (32,), jnp.float32)
    fc_w = 0.01 * jax.random.normal(kfw, (10, 14 * 14 * 32), jnp.float32)
    fc_b = 0.1 * jax.random.normal(kfb, (10,), jnp.float32)

    fwd = jax.jit(cnn_forward)
    out = fwd(x, conv_w, conv_b, gamma, beta, fc_w, fc_b)
    out = jax.block_until_ready(out)
    assert out.shape == (N, 10)

    ref = reference_forward(x, conv_w, conv_b, gamma, beta, fc_w, fc_b)
    # bf16 conv inputs (f32 accumulation) -> slightly looser tolerance than pure f32.
    np.testing.assert_allclose(np.asarray(out), np.asarray(ref), atol=1e-2, rtol=1e-2)

    print("KERNEL_OK")
</pallas_src>

<mosaic_0001>
module attributes {stable_mosaic.version = 11 : i64} {
  func.func @conv_bn_relu_pool_kernel(%arg0: i32, %arg1: memref<800x32xbf16, #tpu.memory_space<vmem>>, %arg2: memref<32x32xbf16, #tpu.memory_space<vmem>>, %arg3: memref<1x32xf32, #tpu.memory_space<vmem>>, %arg4: memref<1x32xf32, #tpu.memory_space<vmem>>, %arg5: memref<1x200x32xf32, #tpu.memory_space<vmem>>) attributes {dimension_semantics = [#tpu.dimension_semantics<parallel>], iteration_bounds = array<i64: 2>, scalar_prefetch = 0 : i64, scratch_operands = 0 : i64, tpu.core_type = #tpu.core_type<tc>, window_params = [{transform_indices = @transform_0, window_bounds = array<i64: 800, 32>}, {pipeline_mode = #tpu.pipeline_mode<synchronous>, transform_indices = @transform_1, window_bounds = array<i64: 32, 32>}, {pipeline_mode = #tpu.pipeline_mode<synchronous>, transform_indices = @transform_2, window_bounds = array<i64: 1, 32>}, {pipeline_mode = #tpu.pipeline_mode<synchronous>, transform_indices = @transform_3, window_bounds = array<i64: 1, 32>}, {transform_indices = @transform_4, window_bounds = array<i64: 1, 200, 32>}]} {
    %c0 = arith.constant 0 : index
    %c0_0 = arith.constant 0 : index
    %0 = vector.load %arg1[%c0, %c0_0] : memref<800x32xbf16, #tpu.memory_space<vmem>>, vector<800x32xbf16>
    %c0_1 = arith.constant 0 : index
    %c0_2 = arith.constant 0 : index
    %1 = vector.load %arg2[%c0_1, %c0_2] : memref<32x32xbf16, #tpu.memory_space<vmem>>, vector<32x32xbf16>
    %cst = arith.constant dense<0.000000e+00> : vector<800x32xf32>
    %2 = tpu.matmul %0, %1, %cst {dimension_numbers = #tpu.dot_dimension_numbers<[1], [0], [0], [1], [0, 0, 1, 1], [], []>} : vector<800x32xbf16>, vector<32x32xbf16>, vector<800x32xf32> -> vector<800x32xf32>
    %c0_3 = arith.constant 0 : index
    %c0_4 = arith.constant 0 : index
    %3 = vector.load %arg3[%c0_3, %c0_4] : memref<1x32xf32, #tpu.memory_space<vmem>>, vector<1x32xf32>
    %4 = vector.broadcast %3 : vector<1x32xf32> to vector<800x32xf32>
    %5 = arith.mulf %2, %4 : vector<800x32xf32>
    %c0_5 = arith.constant 0 : index
    %c0_6 = arith.constant 0 : index
    %6 = vector.load %arg4[%c0_5, %c0_6] : memref<1x32xf32, #tpu.memory_space<vmem>>, vector<1x32xf32>
    %7 = vector.broadcast %6 : vector<1x32xf32> to vector<800x32xf32>
    %8 = arith.addf %5, %7 : vector<800x32xf32>
    %cst_7 = arith.constant 0.000000e+00 : f32
    %9 = vector.broadcast %cst_7 : f32 to vector<800x32xf32>
    %10 = arith.maximumf %8, %9 : vector<800x32xf32>
    %11 = vector.extract_strided_slice %10 {offsets = [0, 0], sizes = [200, 32], strides = [1, 1]} : vector<800x32xf32> to vector<200x32xf32>
    %12 = vector.extract_strided_slice %10 {offsets = [200, 0], sizes = [200, 32], strides = [1, 1]} : vector<800x32xf32> to vector<200x32xf32>
    %13 = arith.maximumf %11, %12 : vector<200x32xf32>
    %14 = vector.extract_strided_slice %10 {offsets = [400, 0], sizes = [200, 32], strides = [1, 1]} : vector<800x32xf32> to vector<200x32xf32>
    %15 = vector.extract_strided_slice %10 {offsets = [600, 0], sizes = [200, 32], strides = [1, 1]} : vector<800x32xf32> to vector<200x32xf32>
    %16 = arith.maximumf %14, %15 : vector<200x32xf32>
    %17 = arith.maximumf %13, %16 : vector<200x32xf32>
    %c0_8 = arith.constant 0 : index
    %c0_9 = arith.constant 0 : index
    %c0_10 = arith.constant 0 : index
    %18 = vector.load %arg5[%c0_8, %c0_9, %c0_10] : memref<1x200x32xf32, #tpu.memory_space<vmem>>, vector<1x200x32xf32>
    %19 = vector.shape_cast %18 : vector<1x200x32xf32> to vector<200x32xf32>
    %20 = vector.shape_cast %17 : vector<200x32xf32> to vector<1x200x32xf32>
    tpu.vector_store %arg5[%c0_8, %c0_9, %c0_10], %20 {strides = array<i32>} : memref<1x200x32xf32, #tpu.memory_space<vmem>>, vector<1x200x32xf32>,
    return
  }
  func.func @transform_0(%arg0: i32) -> (i32, i32) {
    %c0_i32 = arith.constant 0 : i32
    %c0_i32_0 = arith.constant 0 : i32
    return %arg0, %c0_i32 : i32, i32
  }
  func.func @transform_1(%arg0: i32) -> (i32, i32) {
    %c0_i32 = arith.constant 0 : i32
    %c0_i32_0 = arith.constant 0 : i32
    %c0_i32_1 = arith.constant 0 : i32
    return %c0_i32, %c0_i32_0 : i32, i32
  }
  func.func @transform_2(%arg0: i32) -> (i32, i32) {
    %c0_i32 = arith.constant 0 : i32
    %c0_i32_0 = arith.constant 0 : i32
    %c0_i32_1 = arith.constant 0 : i32
    return %c0_i32, %c0_i32_0 : i32, i32
  }
  func.func @transform_3(%arg0: i32) -> (i32, i32) {
    %c0_i32 = arith.constant 0 : i32
    %c0_i32_0 = arith.constant 0 : i32
    %c0_i32_1 = arith.constant 0 : i32
    return %c0_i32, %c0_i32_0 : i32, i32
  }
  func.func @transform_4(%arg0: i32) -> (i32, i32, i32) {
    %c0_i32 = arith.constant 0 : i32
    %c0_i32_0 = arith.constant 0 : i32
    %c0_i32_1 = arith.constant 0 : i32
    return %arg0, %c0_i32, %c0_i32_0 : i32, i32, i32
  }
}

module attributes {stable_mosaic.version = 11 : i64} {
  func.func @fc_kernel(%arg0: i32, %arg1: memref<2x6272xf32, #tpu.memory_space<vmem>>, %arg2: memref<10x6272xf32, #tpu.memory_space<vmem>>, %arg3: memref<1x10xf32, #tpu.memory_space<vmem>>, %arg4: memref<2x10xf32, #tpu.memory_space<vmem>>) attributes {dimension_semantics = [#tpu.dimension_semantics<arbitrary>], iteration_bounds = array<i64: 1>, scalar_prefetch = 0 : i64, scratch_operands = 0 : i64, tpu.core_type = #tpu.core_type<tc>, window_params = [{pipeline_mode = #tpu.pipeline_mode<synchronous>, transform_indices = @transform_0, window_bounds = array<i64: 2, 6272>}, {pipeline_mode = #tpu.pipeline_mode<synchronous>, transform_indices = @transform_1, window_bounds = array<i64: 10, 6272>}, {pipeline_mode = #tpu.pipeline_mode<synchronous>, transform_indices = @transform_2, window_bounds = array<i64: 1, 10>}, {pipeline_mode = #tpu.pipeline_mode<synchronous>, transform_indices = @transform_3, window_bounds = array<i64: 2, 10>}]} {
    %c0 = arith.constant 0 : index
    %c0_0 = arith.constant 0 : index
    %0 = vector.load %arg1[%c0, %c0_0] : memref<2x6272xf32, #tpu.memory_space<vmem>>, vector<2x6272xf32>
    %c0_1 = arith.constant 0 : index
    %c0_2 = arith.constant 0 : index
    %1 = vector.load %arg2[%c0_1, %c0_2] : memref<10x6272xf32, #tpu.memory_space<vmem>>, vector<10x6272xf32>
    %cst = arith.constant dense<0.000000e+00> : vector<2x10xf32>
    %2 = tpu.matmul %0, %1, %cst {dimension_numbers = #tpu.dot_dimension_numbers<[1], [1], [0], [0], [0, 0, 1, 0], [], []>} : vector<2x6272xf32>, vector<10x6272xf32>, vector<2x10xf32> -> vector<2x10xf32>
    %c0_3 = arith.constant 0 : index
    %c0_4 = arith.constant 0 : index
    %3 = vector.load %arg3[%c0_3, %c0_4] : memref<1x10xf32, #tpu.memory_space<vmem>>, vector<1x10xf32>
    %4 = vector.broadcast %3 : vector<1x10xf32> to vector<2x10xf32>
    %5 = arith.addf %2, %4 : vector<2x10xf32>
    %c0_5 = arith.constant 0 : index
    %c0_6 = arith.constant 0 : index
    %6 = vector.load %arg4[%c0_5, %c0_6] : memref<2x10xf32, #tpu.memory_space<vmem>>, vector<2x10xf32>
    tpu.vector_store %arg4[%c0_5, %c0_6], %5 {strides = array<i32>} : memref<2x10xf32, #tpu.memory_space<vmem>>, vector<2x10xf32>,
    return
  }
  func.func @transform_0(%arg0: i32) -> (i32, i32) {
    %c0_i32 = arith.constant 0 : i32
    %c0_i32_0 = arith.constant 0 : i32
    %c0_i32_1 = arith.constant 0 : i32
    return %c0_i32, %c0_i32_0 : i32, i32
  }
  func.func @transform_1(%arg0: i32) -> (i32, i32) {
    %c0_i32 = arith.constant 0 : i32
    %c0_i32_0 = arith.constant 0 : i32
    %c0_i32_1 = arith.constant 0 : i32
    return %c0_i32, %c0_i32_0 : i32, i32
  }
  func.func @transform_2(%arg0: i32) -> (i32, i32) {
    %c0_i32 = arith.constant 0 : i32
    %c0_i32_0 = arith.constant 0 : i32
    %c0_i32_1 = arith.constant 0 : i32
    return %c0_i32, %c0_i32_0 : i32, i32
  }
  func.func @transform_3(%arg0: i32) -> (i32, i32) {
    %c0_i32 = arith.constant 0 : i32
    %c0_i32_0 = arith.constant 0 : i32
    %c0_i32_1 = arith.constant 0 : i32
    return %c0_i32, %c0_i32_0 : i32, i32
  }
}

</mosaic_0001>

<bundles_post_ra>
// kernel: cnn_forward.2
= control target key start
LH: loop header
LB: loop body
LE: loop exit
PB: predicated region body
PF: predicated region fallthrough
CT: control target
= control target key end

     0   :  { %s1811_s15 = smov 0   ;;  %s2217_s0 = inlined_call_operand.vmem [shape: bf16[1600,32], index: 0, kind: input, shape index: {}]   ;;  %s2218_s1 = inlined_call_operand.vmem [shape: bf16[32,32], index: 1, kind: input, shape index: {}]   ;;  %s2219_s2 = inlined_call_operand.vmem [shape: f32[1,32], index: 2, kind: input, shape index: {}]   ;;  %s2220_s3 = inlined_call_operand.vmem [shape: f32[1,32], index: 3, kind: input, shape index: {}]   ;;  %s2221_s4 = inlined_call_operand.vmem [shape: f32[2,200,32], index: 4, kind: output, shape index: {}]  }
   0x1 LB: > { %s1817_s16 = sadd.s32 4294967295, %s1784_s15   ;;  %p1444_p0 = scmp.ge.s32.totalorder %s1784_s15, 1  ;;  %s1784_s15 = sphi %s1811_s15, %s14_s15  }
   0x2   : > { %p163_p1 = scmp.lt.s32.totalorder %s1784_s15, 3 }
   0x4   : > { %p164_p2 = pnand %p1444_p0, %p163_p1 }
   0x5   : > { %s189_s19 = smul.u32 (!%p164_p2), 100, %s1817_s16  ;;  %p195_p4 = scmp.lt.s32.totalorder (!%p164_p2), %s1817_s16, 1 }
   0x6   : > { %167 = sbr.rel (%p164_p2) target bundleno = 363 (0x16b), region = 36 }
   0x7   : > { %p190_p3 = scmp.lt.s32.totalorder (!%p164_p2), %s189_s19, 199 }
   0xb   : > { %v1758_v0 = vld [vmem:[%s2218_s1 + $0x8] sm:$0xff]  ;;  %v1757_v1 = vld [vmem:[%s2218_s1] sm:$0xff]  ;;  %s2223_s19 = smov (!%p190_p3, %s189_s19), 199  ;;  %vm567_vm0 = vcmask 261120   ;;  %s2225_s16 = smov (!%p195_p4, %s1817_s16), 1 }
   0xc   : > { %724 = vmatpush.bf16.msra.mxu0 %v1758_v0  ;;  %1759 = vmatpush.bf16.msra.mxu1 %v1758_v0  ;;  %s1445_s22 = sshll.u32 %s2223_s19, 2  ;;  %v1906_v40 = vld [vmem:[%s2219_s2] ss:$0 sm:$0xff]  ;;  %s1765_s30 = smul.u32 200, %s2225_s16 }
   0xd   : > { %1760 = vmatpush.bf16.msra.mxu2 %v1758_v0  ;;  %1761 = vmatpush.bf16.msra.mxu3 %v1758_v0  ;;  %s1831_s25 = scalar_lea.vmem %s2217_s0, %s1445_s22  ;;  %v1915_v41 = vld [vmem:[%s2220_s3] ss:$0 sm:$0xff] }
   0xe   : > { %v1707_v2 = vld [vmem:[%s1831_s25] sm:$0xff]  ;;  %v1720_v3 = vld [vmem:[%s1831_s25 + $0x68] sm:$0xff]  ;;  %v1733_v4 = vld [vmem:[%s1831_s25 + $0xd0] sm:$0xff]  ;;  %s1959_s7 = scalar_lea.vmem %s2221_s4, %s1765_s30 }
   0xf   : > { %v1746_v5 = vld [vmem:[%s1831_s25 + $0x138] sm:$0xff]  ;;  %v1708_v6 = vld [vmem:[%s1831_s25 + $0x8] sm:$0xff]  ;;  %v1721_v7 = vld [vmem:[%s1831_s25 + $0x70] sm:$0xff] }
  0x10   : > { %725 = vmatpush.bf16.msra.mxu0 %v1757_v1  ;;  %1762 = vmatpush.bf16.msra.mxu1 %v1757_v1  ;;  %v1734_v8 = vld [vmem:[%s1831_s25 + $0xd8] sm:$0xff]  ;;  %v1747_v9 = vld [vmem:[%s1831_s25 + $0x140] sm:$0xff]  ;;  %v1709_v10 = vld [vmem:[%s1831_s25 + $0x10] sm:$0xff] }
  0x11   : > { %1763 = vmatpush.bf16.msra.mxu2 %v1757_v1  ;;  %1764 = vmatpush.bf16.msra.mxu3 %v1757_v1  ;;  %v1722_v11 = vld [vmem:[%s1831_s25 + $0x78] sm:$0xff]  ;;  %v1735_v12 = vld [vmem:[%s1831_s25 + $0xe0] sm:$0xff]  ;;  %v1748_v13 = vld [vmem:[%s1831_s25 + $0x148] sm:$0xff] }
  0x12   : > { %v1710_v14 = vld [vmem:[%s1831_s25 + $0x18] sm:$0xff]  ;;  %v1723_v15 = vld [vmem:[%s1831_s25 + $0x80] sm:$0xff]  ;;  %v1736_v16 = vld [vmem:[%s1831_s25 + $0xe8] sm:$0xff] }
  0x13   : > { %1655 = vmatmul.msk.bf16.vlgmr.msra.gmra.mxu0 %vm567_vm0, %v1707_v2  ;;  %1668 = vmatmul.msk.bf16.vlgmr.msra.gmra.mxu1 %vm567_vm0, %v1720_v3  ;;  %v1749_v17 = vld [vmem:[%s1831_s25 + $0x150] sm:$0xff]  ;;  %v1711_v18 = vld [vmem:[%s1831_s25 + $0x20] sm:$0xff]  ;;  %v1724_v19 = vld [vmem:[%s1831_s25 + $0x88] sm:$0xff] }
  0x14   : > { %1681 = vmatmul.msk.bf16.vlgmr.msra.gmra.mxu2 %vm567_vm0, %v1733_v4  ;;  %1694 = vmatmul.msk.bf16.vlgmr.msra.gmra.mxu3 %vm567_vm0, %v1746_v5  ;;  %v1737_v20 = vld [vmem:[%s1831_s25 + $0xf0] sm:$0xff]  ;;  %v1750_v21 = vld [vmem:[%s1831_s25 + $0x158] sm:$0xff]  ;;  %v1712_v22 = vld [vmem:[%s1831_s25 + $0x28] sm:$0xff] }
  0x15   : > { %v1725_v23 = vld [vmem:[%s1831_s25 + $0x90] sm:$0xff]  ;;  %v1738_v24 = vld [vmem:[%s1831_s25 + $0xf8] sm:$0xff]  ;;  %v1751_v25 = vld [vmem:[%s1831_s25 + $0x160] sm:$0xff] }
  0x16   : > { %v1713_v26 = vld [vmem:[%s1831_s25 + $0x30] sm:$0xff]  ;;  %v1726_v27 = vld [vmem:[%s1831_s25 + $0x98] sm:$0xff]  ;;  %v1739_v28 = vld [vmem:[%s1831_s25 + $0x100] sm:$0xff] }
  0x17   : > { %v1752_v29 = vld [vmem:[%s1831_s25 + $0x168] sm:$0xff]  ;;  %v1714_v30 = vld [vmem:[%s1831_s25 + $0x38] sm:$0xff]  ;;  %v1727_v31 = vld [vmem:[%s1831_s25 + $0xa0] sm:$0xff] }
  0x18   : > { %v1740_v32 = vld [vmem:[%s1831_s25 + $0x108] sm:$0xff]  ;;  %v1753_v33 = vld [vmem:[%s1831_s25 + $0x170] sm:$0xff]  ;;  %v1715_v34 = vld [vmem:[%s1831_s25 + $0x40] sm:$0xff] }
  0x19   : > { %v1728_v35 = vld [vmem:[%s1831_s25 + $0xa8] sm:$0xff]  ;;  %v1741_v38 = vld [vmem:[%s1831_s25 + $0x110] sm:$0xff]  ;;  %v1754_v39 = vld [vmem:[%s1831_s25 + $0x178] sm:$0xff] }
  0x1a   : > { %v1716_v55 = vld [vmem:[%s1831_s25 + $0x48] sm:$0xff]  ;;  %v1729_v56 = vld [vmem:[%s1831_s25 + $0xb0] sm:$0xff]  ;;  %v1742_v60 = vld [vmem:[%s1831_s25 + $0x118] sm:$0xff] }
  0x1b   : > { %v1755_v61 = vld [vmem:[%s1831_s25 + $0x180] sm:$0xff] }
  0x23   : > { %1656 = vmatmul.msk.bf16.gmra.mxu0 %vm567_vm0, %v1708_v6  ;;  %1669 = vmatmul.msk.bf16.gmra.mxu1 %vm567_vm0, %v1721_v7 }
  0x24   : > { %1682 = vmatmul.msk.bf16.gmra.mxu2 %vm567_vm0, %v1734_v8  ;;  %1695 = vmatmul.msk.bf16.gmra.mxu3 %vm567_vm0, %v1747_v9 }
  0x33   : > { %1657 = vmatmul.msk.bf16.gmra.mxu0 %vm567_vm0, %v1709_v10  ;;  %1670 = vmatmul.msk.bf16.gmra.mxu1 %vm567_vm0, %v1722_v11 }
  0x34   : > { %1683 = vmatmul.msk.bf16.gmra.mxu2 %vm567_vm0, %v1735_v12  ;;  %1696 = vmatmul.msk.bf16.gmra.mxu3 %vm567_vm0, %v1748_v13 }
  0x43   : > { %1658 = vmatmul.msk.bf16.gmra.mxu0 %vm567_vm0, %v1710_v14  ;;  %1671 = vmatmul.msk.bf16.gmra.mxu1 %vm567_vm0, %v1723_v15 }
  0x44   : > { %1684 = vmatmul.msk.bf16.gmra.mxu2 %vm567_vm0, %v1736_v16  ;;  %1697 = vmatmul.msk.bf16.gmra.mxu3 %vm567_vm0, %v1749_v17 }
  0x53   : > { %1659 = vmatmul.msk.bf16.gmra.mxu0 %vm567_vm0, %v1711_v18  ;;  %1672 = vmatmul.msk.bf16.gmra.mxu1 %vm567_vm0, %v1724_v19 }
  0x54   : > { %1685 = vmatmul.msk.bf16.gmra.mxu2 %vm567_vm0, %v1737_v20  ;;  %1698 = vmatmul.msk.bf16.gmra.mxu3 %vm567_vm0, %v1750_v21 }
  0x63   : > { %1660 = vmatmul.msk.bf16.gmra.mxu0 %vm567_vm0, %v1712_v22  ;;  %1673 = vmatmul.msk.bf16.gmra.mxu1 %vm567_vm0, %v1725_v23 }
  0x64   : > { %1686 = vmatmul.msk.bf16.gmra.mxu2 %vm567_vm0, %v1738_v24  ;;  %1699 = vmatmul.msk.bf16.gmra.mxu3 %vm567_vm0, %v1751_v25 }
  0x73   : > { %1661 = vmatmul.msk.bf16.gmra.mxu0 %vm567_vm0, %v1713_v26  ;;  %1674 = vmatmul.msk.bf16.gmra.mxu1 %vm567_vm0, %v1726_v27 }
  0x74   : > { %1687 = vmatmul.msk.bf16.gmra.mxu2 %vm567_vm0, %v1739_v28  ;;  %1700 = vmatmul.msk.bf16.gmra.mxu3 %vm567_vm0, %v1752_v29  ;;  %v1717_v28 = vld [vmem:[%s1831_s25 + $0x50] sm:$0xff]  ;;  %v1730_v29 = vld [vmem:[%s1831_s25 + $0xb8] sm:$0xff] }
  0x83   : > { %1662 = vmatmul.msk.bf16.gmra.mxu0 %vm567_vm0, %v1714_v30  ;;  %1675 = vmatmul.msk.bf16.gmra.mxu1 %vm567_vm0, %v1727_v31 }
  0x84   : > { %1688 = vmatmul.msk.bf16.gmra.mxu2 %vm567_vm0, %v1740_v32  ;;  %1701 = vmatmul.msk.bf16.gmra.mxu3 %vm567_vm0, %v1753_v33  ;;  %v1743_v33 = vld [vmem:[%s1831_s25 + $0x120] sm:$0xff] }
  0x90   : > { %v1899_v36 = vpop.f32.mrf.mxu0  ;;  %v792_v37 = vpop.f32.mrf.mxu1 }
  0x91   : > { %v1007_v42 = vmul.f32 %v1906_v40, %v792_v37 }
  0x93   : > { %1663 = vmatmul.msk.bf16.gmra.mxu0 %vm567_vm0, %v1715_v34  ;;  %1676 = vmatmul.msk.bf16.gmra.mxu1 %vm567_vm0, %v1728_v35  ;;  %v1111_v47 = vadd.f32 %v1915_v41, %v1007_v42  ;;  %v1756_v34 = vld [vmem:[%s1831_s25 + $0x188] sm:$0xff] }
  0x94   : > { %1689 = vmatmul.msk.bf16.gmra.mxu2 %vm567_vm0, %v1741_v38  ;;  %1702 = vmatmul.msk.bf16.gmra.mxu3 %vm567_vm0, %v1754_v39 }
  0x95   : > { %v1211_v50 = vmax.f32 %v1111_v47, 0.0 }
  0x97   : > { %v1918_v43 = vpop.f32.mrf.mxu2  ;;  %v922_v44 = vpop.f32.mrf.mxu3 }
  0x98   : > { %v729_v45 = vpop.f32.mrf.mxu0  ;;  %v794_v46 = vpop.f32.mrf.mxu1  ;;  %v1059_v0 = vmul.f32 %v1906_v40, %v922_v44 }
  0x99   : > { %v982_v48 = vmul.f32 %v1906_v40, %v729_v45  ;;  %v1008_v52 = vmul.f32 %v1906_v40, %v794_v46 }
  0x9a   : > { %v1163_v6 = vadd.f32 %v1915_v41, %v1059_v0 }
  0x9b   : > { %v1086_v49 = vadd.f32 %v1915_v41, %v982_v48  ;;  %v1112_v62 = vadd.f32 %v1915_v41, %v1008_v52 }
  0x9c   : > { %v1263_v15 = vmax.f32 %v1163_v6, 0.0 }
  0x9d   : > { %v1186_v51 = vmax.f32 %v1086_v49, 0.0  ;;  %v1212_v3 = vmax.f32 %v1112_v62, 0.0 }
  0x9f   : > { %v1924_v53 = vmax.f32 %v1186_v51, %v1211_v50  ;;  %v859_v54 = vpop.f32.mrf.mxu2  ;;  %v924_v57 = vpop.f32.mrf.mxu3 }
  0xa0   : > { %v732_v58 = vpop.f32.mrf.mxu0  ;;  %v797_v59 = vpop.f32.mrf.mxu1  ;;  %v1034_v1 = vmul.f32 %v1906_v40, %v859_v54  ;;  %v1060_v18 = vmul.f32 %v1906_v40, %v924_v57 }
  0xa1   : > { %v983_v63 = vmul.f32 %v1906_v40, %v732_v58  ;;  %v1009_v5 = vmul.f32 %v1906_v40, %v797_v59 }
  0xa2   : > { %v1138_v7 = vadd.f32 %v1915_v41, %v1034_v1  ;;  %v1164_v25 = vadd.f32 %v1915_v41, %v1060_v18 }
  0xa3   : > { %v1087_v2 = vadd.f32 %v1915_v41, %v983_v63  ;;  %1664 = vmatmul.msk.bf16.gmra.mxu0 %vm567_vm0, %v1716_v55  ;;  %1677 = vmatmul.msk.bf16.gmra.mxu1 %vm567_vm0, %v1729_v56  ;;  %v1113_v13 = vadd.f32 %v1915_v41, %v1009_v5 }
  0xa4   : > { %1690 = vmatmul.msk.bf16.gmra.mxu2 %vm567_vm0, %v1742_v60  ;;  %1703 = vmatmul.msk.bf16.gmra.mxu3 %vm567_vm0, %v1755_v61  ;;  %v1238_v16 = vmax.f32 %v1138_v7, 0.0  ;;  %v1264_v44 = vmax.f32 %v1164_v25, 0.0 }
  0xa5   : > { %v1187_v4 = vmax.f32 %v1087_v2, 0.0  ;;  %v1213_v20 = vmax.f32 %v1113_v13, 0.0  ;;  %v1731_v13 = vld [vmem:[%s1831_s25 + $0xc0] sm:$0xff] }
  0xa6   : > { %v1313_v23 = vmax.f32 %v1238_v16, %v1263_v15 }
  0xa7   : > { %v1943_v8 = vmax.f32 %v1187_v4, %v1212_v3  ;;  %v862_v9 = vpop.f32.mrf.mxu2  ;;  %v927_v10 = vpop.f32.mrf.mxu3 }
  0xa8   : > { %v734_v11 = vpop.f32.mrf.mxu0  ;;  %v799_v12 = vpop.f32.mrf.mxu1  ;;  %v1035_v17 = vmul.f32 %v1906_v40, %v862_v9  ;;  %v1061_v39 = vmul.f32 %v1906_v40, %v927_v10 }
  0xa9   : > { %v984_v14 = vmul.f32 %v1906_v40, %v734_v11  ;;  %v1010_v22 = vmul.f32 %v1906_v40, %v799_v12  ;;  %v1718_v12 = vld [vmem:[%s1831_s25 + $0x58] sm:$0xff] }
  0xaa   : > { %v1139_v24 = vadd.f32 %v1915_v41, %v1035_v17  ;;  %v1165_v50 = vadd.f32 %v1915_v41, %v1061_v39  ;;  %v1744_v17 = vld [vmem:[%s1831_s25 + $0x128] sm:$0xff] }
  0xab   : > { %v1088_v19 = vadd.f32 %v1915_v41, %v984_v14  ;;  %v1114_v37 = vadd.f32 %v1915_v41, %v1010_v22 }
  0xac   : > { %v1239_v42 = vmax.f32 %v1139_v24, 0.0  ;;  %v1265_v62 = vmax.f32 %v1165_v50, 0.0 }
  0xad   : > { %v1188_v21 = vmax.f32 %v1088_v19, 0.0  ;;  %v1214_v47 = vmax.f32 %v1114_v37, 0.0 }
  0xae   : > { %v1314_v51 = vmax.f32 %v1239_v42, %v1264_v44 }
  0xaf   : > { %v1288_v26 = vmax.f32 %v1188_v21, %v1213_v20  ;;  %v864_v27 = vpop.f32.mrf.mxu2  ;;  %v929_v30 = vpop.f32.mrf.mxu3 }
  0xb0   : > { %v737_v31 = vpop.f32.mrf.mxu0  ;;  %v802_v32 = vpop.f32.mrf.mxu1  ;;  %v1036_v45 = vmul.f32 %v1906_v40, %v864_v27  ;;  %v1062_v1 = vmul.f32 %v1906_v40, %v929_v30 }
  0xb1   : > { %v1338_v35 = vmax.f32 %v1288_v26, %v1313_v23  ;;  %v985_v38 = vmul.f32 %v1906_v40, %v737_v31  ;;  %v1011_v49 = vmul.f32 %v1906_v40, %v802_v32 }
  0xb2   : > { %v1140_v52 = vadd.f32 %v1915_v41, %v1036_v45  ;;  %v1166_v9 = vadd.f32 %v1915_v41, %v1062_v1 }
  0xb3   : > { %1363 = vst.msk [vmem:[%s1959_s7 + $0x18] sm:$0xff] %vm567_vm0, %v1338_v35  ;;  %v1089_v46 = vadd.f32 %v1915_v41, %v985_v38  ;;  %1665 = vmatmul.msk.bf16.gmra.mxu0 %vm567_vm0, %v1717_v28  ;;  %1678 = vmatmul.msk.bf16.gmra.mxu1 %vm567_vm0, %v1730_v29  ;;  %v1115_v60 = vadd.f32 %v1915_v41, %v1011_v49 }
  0xb4   : > { %1691 = vmatmul.msk.bf16.gmra.mxu2 %vm567_vm0, %v1743_v33  ;;  %1704 = vmatmul.msk.bf16.gmra.mxu3 %vm567_vm0, %v1756_v34  ;;  %v1240_v63 = vmax.f32 %v1140_v52, 0.0  ;;  %v1266_v23 = vmax.f32 %v1166_v9, 0.0 }
  0xb5   : > { %v1189_v48 = vmax.f32 %v1089_v46, 0.0  ;;  %v1215_v3 = vmax.f32 %v1115_v60, 0.0 }
  0xb6   : > { %v1315_v6 = vmax.f32 %v1240_v63, %v1265_v62  ;;  %v1745_v63 = vld [vmem:[%s1831_s25 + $0x130] sm:$0xff] }
  0xb7   : > { %v1289_v54 = vmax.f32 %v1189_v48, %v1214_v47  ;;  %v867_v55 = vpop.f32.mrf.mxu2  ;;  %v932_v56 = vpop.f32.mrf.mxu3 }
  0xb8   : > { %v739_v57 = vpop.f32.mrf.mxu0  ;;  %v804_v58 = vpop.f32.mrf.mxu1  ;;  %v1037_v0 = vmul.f32 %v1906_v40, %v867_v55  ;;  %v1063_v21 = vmul.f32 %v1906_v40, %v932_v56 }
  0xb9   : > { %v1339_v59 = vmax.f32 %v1289_v54, %v1314_v51  ;;  %v986_v61 = vmul.f32 %v1906_v40, %v739_v57  ;;  %v1012_v5 = vmul.f32 %v1906_v40, %v804_v58  ;;  %v1719_v58 = vld [vmem:[%s1831_s25 + $0x60] sm:$0xff] }
  0xba   : > { %v1141_v7 = vadd.f32 %v1915_v41, %v1037_v0  ;;  %v1167_v29 = vadd.f32 %v1915_v41, %v1063_v21 }
  0xbb   : > { %1364 = vst.msk [vmem:[%s1959_s7 + $0x20] sm:$0xff] %vm567_vm0, %v1339_v59  ;;  %v1090_v2 = vadd.f32 %v1915_v41, %v986_v61  ;;  %v1116_v19 = vadd.f32 %v1915_v41, %v1012_v5  ;;  %v1732_v59 = vld [vmem:[%s1831_s25 + $0xc8] sm:$0xff] }
  0xbc   : > { %v1241_v22 = vmax.f32 %v1141_v7, 0.0  ;;  %v1267_v44 = vmax.f32 %v1167_v29, 0.0 }
  0xbd   : > { %v1190_v4 = vmax.f32 %v1090_v2, 0.0  ;;  %v1216_v26 = vmax.f32 %v1116_v19, 0.0 }
  0xbe   : > { %v1316_v30 = vmax.f32 %v1241_v22, %v1266_v23 }
  0xbf   : > { %v1290_v10 = vmax.f32 %v1190_v4, %v1215_v3  ;;  %v869_v11 = vpop.f32.mrf.mxu2  ;;  %v934_v14 = vpop.f32.mrf.mxu3 }
  0xc0   : > { %v742_v15 = vpop.f32.mrf.mxu0  ;;  %v807_v16 = vpop.f32.mrf.mxu1  ;;  %v1038_v24 = vmul.f32 %v1906_v40, %v869_v11  ;;  %v1064_v47 = vmul.f32 %v1906_v40, %v934_v14 }
  0xc1   : > { %v1340_v18 = vmax.f32 %v1290_v10, %v1315_v6  ;;  %v987_v20 = vmul.f32 %v1906_v40, %v742_v15  ;;  %v1013_v28 = vmul.f32 %v1906_v40, %v807_v16 }
  0xc2   : > { %v1142_v31 = vadd.f32 %v1915_v41, %v1038_v24  ;;  %v1168_v55 = vadd.f32 %v1915_v41, %v1064_v47 }
  0xc3   : > { %1365 = vst.msk [vmem:[%s1959_s7 + $0x28] sm:$0xff] %vm567_vm0, %v1340_v18  ;;  %v1091_v25 = vadd.f32 %v1915_v41, %v987_v20  ;;  %1666 = vmatmul.msk.bf16.gmra.mxu0 %vm567_vm0, %v1718_v12  ;;  %1679 = vmatmul.msk.bf16.gmra.mxu1 %vm567_vm0, %v1731_v13  ;;  %v1117_v39 = vadd.f32 %v1915_v41, %v1013_v28 }
  0xc4   : > { %1692 = vmatmul.msk.bf16.gmra.mxu2 %vm567_vm0, %v1744_v17  ;;  %v1242_v45 = vmax.f32 %v1142_v31, 0.0  ;;  %v1268_v5 = vmax.f32 %v1168_v55, 0.0 }
  0xc5   : > { %v1191_v27 = vmax.f32 %v1091_v25, 0.0  ;;  %v1217_v49 = vmax.f32 %v1117_v39, 0.0 }
  0xc6   : > { %v1317_v52 = vmax.f32 %v1242_v45, %v1267_v44 }
  0xc7   : > { %v1291_v32 = vmax.f32 %v1191_v27, %v1216_v26  ;;  %v872_v33 = vpop.f32.mrf.mxu2  ;;  %v937_v34 = vpop.f32.mrf.mxu3 }
  0xc8   : > { %v744_v35 = vpop.f32.mrf.mxu0  ;;  %v809_v37 = vpop.f32.mrf.mxu1  ;;  %v1039_v46 = vmul.f32 %v1906_v40, %v872_v33  ;;  %v1065_v3 = vmul.f32 %v1906_v40, %v937_v34 }
  0xc9   : > { %v1341_v38 = vmax.f32 %v1291_v32, %v1316_v30  ;;  %v988_v42 = vmul.f32 %v1906_v40, %v744_v35  ;;  %v1014_v51 = vmul.f32 %v1906_v40, %v809_v37 }
  0xca   : > { %v1143_v54 = vadd.f32 %v1915_v41, %v1039_v46  ;;  %v1169_v12 = vadd.f32 %v1915_v41, %v1065_v3 }
  0xcb   : > { %1366 = vst.msk [vmem:[%s1959_s7 + $0x30] sm:$0xff] %vm567_vm0, %v1341_v38  ;;  %v1092_v48 = vadd.f32 %v1915_v41, %v988_v42  ;;  %v1118_v1 = vadd.f32 %v1915_v41, %v1014_v51 }
  0xcc   : > { %v1243_v4 = vmax.f32 %v1143_v54, 0.0  ;;  %v1269_v23 = vmax.f32 %v1169_v12, 0.0 }
  0xcd   : > { %v1192_v50 = vmax.f32 %v1092_v48, 0.0  ;;  %v1218_v9 = vmax.f32 %v1118_v1, 0.0 }
  0xce   : > { %v1318_v13 = vmax.f32 %v1243_v4, %v1268_v5 }
  0xcf   : > { %v1292_v56 = vmax.f32 %v1192_v50, %v1217_v49  ;;  %v874_v57 = vpop.f32.mrf.mxu2  ;;  %v939_v60 = vpop.f32.mrf.mxu3 }
  0xd0   : > { %v747_v61 = vpop.f32.mrf.mxu0  ;;  %v812_v62 = vpop.f32.mrf.mxu1  ;;  %v1040_v6 = vmul.f32 %v1906_v40, %v874_v57  ;;  %v1066_v26 = vmul.f32 %v1906_v40, %v939_v60 }
  0xd1   : > { %v1342_v0 = vmax.f32 %v1292_v56, %v1317_v52  ;;  %v989_v2 = vmul.f32 %v1906_v40, %v747_v61  ;;  %v1015_v11 = vmul.f32 %v1906_v40, %v812_v62 }
  0xd2   : > { %v1144_v14 = vadd.f32 %v1915_v41, %v1040_v6  ;;  %v1170_v33 = vadd.f32 %v1915_v41, %v1066_v26 }
  0xd3   : > { %1367 = vst.msk [vmem:[%s1959_s7 + $0x38] sm:$0xff] %vm567_vm0, %v1342_v0  ;;  %v1093_v7 = vadd.f32 %v1915_v41, %v989_v2  ;;  %1667 = vmatmul.msk.bf16.gmra.mxu0 %vm567_vm0, %v1719_v58  ;;  %1680 = vmatmul.msk.bf16.gmra.mxu1 %vm567_vm0, %v1732_v59  ;;  %v1119_v21 = vadd.f32 %v1915_v41, %v1015_v11 }
  0xd4   : > { %1693 = vmatmul.msk.bf16.gmra.mxu2 %vm567_vm0, %v1745_v63  ;;  %v1244_v24 = vmax.f32 %v1144_v14, 0.0  ;;  %v1270_v48 = vmax.f32 %v1170_v33, 0.0 }
  0xd5   : > { %v1193_v10 = vmax.f32 %v1093_v7, 0.0  ;;  %v1219_v28 = vmax.f32 %v1119_v21, 0.0 }
  0xd6   : > { %v1319_v31 = vmax.f32 %v1244_v24, %v1269_v23 }
  0xd7   : > { %v1293_v15 = vmax.f32 %v1193_v10, %v1218_v9  ;;  %v877_v16 = vpop.f32.mrf.mxu2  ;;  %v942_v17 = vpop.f32.mrf.mxu3 }
  0xd8   : > { %v749_v18 = vpop.f32.mrf.mxu0  ;;  %v814_v19 = vpop.f32.mrf.mxu1  ;;  %v1041_v25 = vmul.f32 %v1906_v40, %v877_v16  ;;  %v1067_v46 = vmul.f32 %v1906_v40, %v942_v17 }
  0xd9   : > { %v1343_v20 = vmax.f32 %v1293_v15, %v1318_v13  ;;  %v990_v22 = vmul.f32 %v1906_v40, %v749_v18  ;;  %v1016_v30 = vmul.f32 %v1906_v40, %v814_v19 }
  0xda   : > { %v1145_v32 = vadd.f32 %v1915_v41, %v1041_v25  ;;  %v1171_v55 = vadd.f32 %v1915_v41, %v1067_v46 }
  0xdb   : > { %1368 = vst.msk [vmem:[%s1959_s7 + $0x40] sm:$0xff] %vm567_vm0, %v1343_v20  ;;  %v1094_v27 = vadd.f32 %v1915_v41, %v990_v22  ;;  %v1120_v44 = vadd.f32 %v1915_v41, %v1016_v30 }
  0xdc   : > { %v1245_v47 = vmax.f32 %v1145_v32, 0.0  ;;  %v1271_v2 = vmax.f32 %v1171_v55, 0.0 }
  0xdd   : > { %v1194_v29 = vmax.f32 %v1094_v27, 0.0  ;;  %v1220_v51 = vmax.f32 %v1120_v44, 0.0 }
  0xde   : > { %v1320_v56 = vmax.f32 %v1245_v47, %v1270_v48 }
  0xdf   : > { %v1294_v34 = vmax.f32 %v1194_v29, %v1219_v28  ;;  %v879_v35 = vpop.f32.mrf.mxu2  ;;  %v944_v37 = vpop.f32.mrf.mxu3 }
  0xe0   : > { %v752_v38 = vpop.f32.mrf.mxu0  ;;  %v817_v39 = vpop.f32.mrf.mxu1  ;;  %v1042_v49 = vmul.f32 %v1906_v40, %v879_v35  ;;  %v1068_v5 = vmul.f32 %v1906_v40, %v944_v37 }
  0xe1   : > { %v1344_v42 = vmax.f32 %v1294_v34, %v1319_v31  ;;  %v991_v45 = vmul.f32 %v1906_v40, %v752_v38  ;;  %v1017_v54 = vmul.f32 %v1906_v40, %v817_v39 }
  0xe2   : > { %v1146_v57 = vadd.f32 %v1915_v41, %v1042_v49  ;;  %v1172_v13 = vadd.f32 %v1915_v41, %v1068_v5 }
  0xe3   : > { %1369 = vst.msk [vmem:[%s1959_s7 + $0x48] sm:$0xff] %vm567_vm0, %v1344_v42  ;;  %v1095_v50 = vadd.f32 %v1915_v41, %v991_v45  ;;  %v1121_v0 = vadd.f32 %v1915_v41, %v1017_v54 }
  0xe4   : > { %v1246_v3 = vmax.f32 %v1146_v57, 0.0  ;;  %v1272_v24 = vmax.f32 %v1172_v13, 0.0 }
  0xe5   : > { %v1195_v52 = vmax.f32 %v1095_v50, 0.0  ;;  %v1221_v7 = vmax.f32 %v1121_v0, 0.0 }
  0xe6   : > { %v1321_v11 = vmax.f32 %v1246_v3, %v1271_v2 }
  0xe7   : > { %v1295_v58 = vmax.f32 %v1195_v52, %v1220_v51  ;;  %v882_v59 = vpop.f32.mrf.mxu2  ;;  %v947_v60 = vpop.f32.mrf.mxu3 }
  0xe8   : > { %v754_v61 = vpop.f32.mrf.mxu0  ;;  %v819_v62 = vpop.f32.mrf.mxu1  ;;  %v1043_v4 = vmul.f32 %v1906_v40, %v882_v59  ;;  %v1069_v22 = vmul.f32 %v1906_v40, %v947_v60 }
  0xe9   : > { %v1345_v63 = vmax.f32 %v1295_v58, %v1320_v56  ;;  %v992_v1 = vmul.f32 %v1906_v40, %v754_v61  ;;  %v1018_v10 = vmul.f32 %v1906_v40, %v819_v62 }
  0xea   : > { %v1147_v12 = vadd.f32 %v1915_v41, %v1043_v4  ;;  %v1173_v30 = vadd.f32 %v1915_v41, %v1069_v22 }
  0xeb   : > { %1370 = vst.msk [vmem:[%s1959_s7 + $0x50] sm:$0xff] %vm567_vm0, %v1345_v63  ;;  %v1096_v6 = vadd.f32 %v1915_v41, %v992_v1  ;;  %v1122_v20 = vadd.f32 %v1915_v41, %v1018_v10 }
  0xec   : > { %v1247_v23 = vmax.f32 %v1147_v12, 0.0  ;;  %v1273_v45 = vmax.f32 %v1173_v30, 0.0 }
  0xed   : > { %v1196_v9 = vmax.f32 %v1096_v6, 0.0  ;;  %v1222_v27 = vmax.f32 %v1122_v20, 0.0 }
  0xee   : > { %v1322_v31 = vmax.f32 %v1247_v23, %v1272_v24 }
  0xef   : > { %v1296_v14 = vmax.f32 %v1196_v9, %v1221_v7  ;;  %v884_v15 = vpop.f32.mrf.mxu2  ;;  %v949_v16 = vpop.f32.mrf.mxu3 }
  0xf0   : > { %v757_v17 = vpop.f32.mrf.mxu0  ;;  %v822_v18 = vpop.f32.mrf.mxu1  ;;  %v1044_v25 = vmul.f32 %v1906_v40, %v884_v15  ;;  %v1070_v48 = vmul.f32 %v1906_v40, %v949_v16 }
  0xf1   : > { %v1346_v19 = vmax.f32 %v1296_v14, %v1321_v11  ;;  %v993_v21 = vmul.f32 %v1906_v40, %v757_v17  ;;  %v1019_v29 = vmul.f32 %v1906_v40, %v822_v18 }
  0xf2   : > { %v1148_v32 = vadd.f32 %v1915_v41, %v1044_v25  ;;  %v1174_v56 = vadd.f32 %v1915_v41, %v1070_v48 }
  0xf3   : > { %1371 = vst.msk [vmem:[%s1959_s7 + $0x58] sm:$0xff] %vm567_vm0, %v1346_v19  ;;  %v1097_v26 = vadd.f32 %v1915_v41, %v993_v21  ;;  %v1123_v42 = vadd.f32 %v1915_v41, %v1019_v29 }
  0xf4   : > { %v1248_v46 = vmax.f32 %v1148_v32, 0.0  ;;  %v1274_v3 = vmax.f32 %v1174_v56, 0.0 }
  0xf5   : > { %v1197_v28 = vmax.f32 %v1097_v26, 0.0  ;;  %v1223_v50 = vmax.f32 %v1123_v42, 0.0 }
  0xf6   : > { %v1323_v54 = vmax.f32 %v1248_v46, %v1273_v45 }
  0xf7   : > { %v1297_v33 = vmax.f32 %v1197_v28, %v1222_v27  ;;  %v887_v34 = vpop.f32.mrf.mxu2  ;;  %v952_v35 = vpop.f32.mrf.mxu3 }
  0xf8   : > { %v759_v37 = vpop.f32.mrf.mxu0  ;;  %v824_v38 = vpop.f32.mrf.mxu1  ;;  %v1045_v47 = vmul.f32 %v1906_v40, %v887_v34  ;;  %v1071_v1 = vmul.f32 %v1906_v40, %v952_v35 }
  0xf9   : > { %v1347_v39 = vmax.f32 %v1297_v33, %v1322_v31  ;;  %v994_v44 = vmul.f32 %v1906_v40, %v759_v37  ;;  %v1020_v52 = vmul.f32 %v1906_v40, %v824_v38 }
  0xfa   : > { %v1149_v55 = vadd.f32 %v1915_v41, %v1045_v47  ;;  %v1175_v10 = vadd.f32 %v1915_v41, %v1071_v1 }
  0xfb   : > { %1372 = vst.msk [vmem:[%s1959_s7 + $0x60] sm:$0xff] %vm567_vm0, %v1347_v39  ;;  %v1098_v49 = vadd.f32 %v1915_v41, %v994_v44  ;;  %v1124_v63 = vadd.f32 %v1915_v41, %v1020_v52 }
  0xfc   : > { %v1249_v2 = vmax.f32 %v1149_v55, 0.0  ;;  %v1275_v21 = vmax.f32 %v1175_v10, 0.0 }
  0xfd   : > { %v1198_v51 = vmax.f32 %v1098_v49, 0.0  ;;  %v1224_v6 = vmax.f32 %v1124_v63, 0.0 }
  0xfe   : > { %v1324_v11 = vmax.f32 %v1249_v2, %v1274_v3 }
  0xff   : > { %v1298_v57 = vmax.f32 %v1198_v51, %v1223_v50  ;;  %v889_v58 = vpop.f32.mrf.mxu2  ;;  %v954_v59 = vpop.f32.mrf.mxu3 }
 0x100   : > { %v762_v60 = vpop.f32.mrf.mxu0  ;;  %v827_v61 = vpop.f32.mrf.mxu1  ;;  %v1046_v4 = vmul.f32 %v1906_v40, %v889_v58  ;;  %v1072_v24 = vmul.f32 %v1906_v40, %v954_v59 }
 0x101   : > { %v1348_v62 = vmax.f32 %v1298_v57, %v1323_v54  ;;  %v995_v0 = vmul.f32 %v1906_v40, %v762_v60  ;;  %v1021_v9 = vmul.f32 %v1906_v40, %v827_v61 }
 0x102   : > { %v1150_v12 = vadd.f32 %v1915_v41, %v1046_v4  ;;  %v1176_v31 = vadd.f32 %v1915_v41, %v1072_v24 }
 0x103   : > { %1373 = vst.msk [vmem:[%s1959_s7 + $0x68] sm:$0xff] %vm567_vm0, %v1348_v62  ;;  %v1099_v5 = vadd.f32 %v1915_v41, %v995_v0  ;;  %v1125_v19 = vadd.f32 %v1915_v41, %v1021_v9 }
 0x104   : > { %v1250_v22 = vmax.f32 %v1150_v12, 0.0  ;;  %v1276_v46 = vmax.f32 %v1176_v31, 0.0 }
 0x105   : > { %v1199_v7 = vmax.f32 %v1099_v5, 0.0  ;;  %v1225_v26 = vmax.f32 %v1125_v19, 0.0 }
 0x106   : > { %v1325_v29 = vmax.f32 %v1250_v22, %v1275_v21 }
 0x107   : > { %v1299_v13 = vmax.f32 %v1199_v7, %v1224_v6  ;;  %v892_v14 = vpop.f32.mrf.mxu2  ;;  %v957_v15 = vpop.f32.mrf.mxu3 }
 0x108   : > { %v764_v16 = vpop.f32.mrf.mxu0  ;;  %v829_v17 = vpop.f32.mrf.mxu1  ;;  %v1047_v23 = vmul.f32 %v1906_v40, %v892_v14  ;;  %v1073_v44 = vmul.f32 %v1906_v40, %v957_v15 }
 0x109   : > { %v1349_v18 = vmax.f32 %v1299_v13, %v1324_v11  ;;  %v996_v20 = vmul.f32 %v1906_v40, %v764_v16  ;;  %v1022_v28 = vmul.f32 %v1906_v40, %v829_v17 }
 0x10a   : > { %v1151_v30 = vadd.f32 %v1915_v41, %v1047_v23  ;;  %v1177_v52 = vadd.f32 %v1915_v41, %v1073_v44 }
 0x10b   : > { %1374 = vst.msk [vmem:[%s1959_s7 + $0x70] sm:$0xff] %vm567_vm0, %v1349_v18  ;;  %v1100_v25 = vadd.f32 %v1915_v41, %v996_v20  ;;  %v1126_v39 = vadd.f32 %v1915_v41, %v1022_v28 }
 0x10c   : > { %v1251_v45 = vmax.f32 %v1151_v30, 0.0  ;;  %v1277_v0 = vmax.f32 %v1177_v52, 0.0 }
 0x10d   : > { %v1200_v27 = vmax.f32 %v1100_v25, 0.0  ;;  %v1226_v49 = vmax.f32 %v1126_v39, 0.0 }
 0x10e   : > { %v1326_v54 = vmax.f32 %v1251_v45, %v1276_v46 }
 0x10f   : > { %v1300_v32 = vmax.f32 %v1200_v27, %v1225_v26  ;;  %v894_v33 = vpop.f32.mrf.mxu2  ;;  %v959_v34 = vpop.f32.mrf.mxu3 }
 0x110   : > { %v767_v35 = vpop.f32.mrf.mxu0  ;;  %v832_v37 = vpop.f32.mrf.mxu1  ;;  %v1048_v47 = vmul.f32 %v1906_v40, %v894_v33  ;;  %v1074_v3 = vmul.f32 %v1906_v40, %v959_v34 }
 0x111   : > { %v1350_v38 = vmax.f32 %v1300_v32, %v1325_v29  ;;  %v997_v42 = vmul.f32 %v1906_v40, %v767_v35  ;;  %v1023_v51 = vmul.f32 %v1906_v40, %v832_v37 }
 0x112   : > { %v1152_v55 = vadd.f32 %v1915_v41, %v1048_v47  ;;  %v1178_v11 = vadd.f32 %v1915_v41, %v1074_v3 }
 0x113   : > { %1375 = vst.msk [vmem:[%s1959_s7 + $0x78] sm:$0xff] %vm567_vm0, %v1350_v38  ;;  %v1101_v48 = vadd.f32 %v1915_v41, %v997_v42  ;;  %v1127_v62 = vadd.f32 %v1915_v41, %v1023_v51 }
 0x114   : > { %v1252_v1 = vmax.f32 %v1152_v55, 0.0  ;;  %v1278_v22 = vmax.f32 %v1178_v11, 0.0 }
 0x115   : > { %v1201_v50 = vmax.f32 %v1101_v48, 0.0  ;;  %v1227_v5 = vmax.f32 %v1127_v62, 0.0 }
 0x116   : > { %v1327_v9 = vmax.f32 %v1252_v1, %v1277_v0 }
 0x117   : > { %v1301_v56 = vmax.f32 %v1201_v50, %v1226_v49  ;;  %v897_v57 = vpop.f32.mrf.mxu2  ;;  %v962_v58 = vpop.f32.mrf.mxu3 }
 0x118   : > { %v769_v59 = vpop.f32.mrf.mxu0  ;;  %v834_v60 = vpop.f32.mrf.mxu1  ;;  %v1049_v2 = vmul.f32 %v1906_v40, %v897_v57  ;;  %v1075_v20 = vmul.f32 %v1906_v40, %v962_v58 }
 0x119   : > { %v1351_v61 = vmax.f32 %v1301_v56, %v1326_v54  ;;  %v998_v63 = vmul.f32 %v1906_v40, %v769_v59  ;;  %v1024_v7 = vmul.f32 %v1906_v40, %v834_v60 }
 0x11a   : > { %v1153_v10 = vadd.f32 %v1915_v41, %v1049_v2  ;;  %v1179_v28 = vadd.f32 %v1915_v41, %v1075_v20 }
 0x11b   : > { %1376 = vst.msk [vmem:[%s1959_s7 + $0x80] sm:$0xff] %vm567_vm0, %v1351_v61  ;;  %v1102_v4 = vadd.f32 %v1915_v41, %v998_v63  ;;  %v1128_v18 = vadd.f32 %v1915_v41, %v1024_v7 }
 0x11c   : > { %v1253_v21 = vmax.f32 %v1153_v10, 0.0  ;;  %v1279_v42 = vmax.f32 %v1179_v28, 0.0 }
 0x11d   : > { %v1202_v6 = vmax.f32 %v1102_v4, 0.0  ;;  %v1228_v25 = vmax.f32 %v1128_v18, 0.0 }
 0x11e   : > { %v1328_v29 = vmax.f32 %v1253_v21, %v1278_v22 }
 0x11f   : > { %v1302_v12 = vmax.f32 %v1202_v6, %v1227_v5  ;;  %v899_v13 = vpop.f32.mrf.mxu2  ;;  %v964_v14 = vpop.f32.mrf.mxu3 }
 0x120   : > { %v772_v15 = vpop.f32.mrf.mxu0  ;;  %v837_v16 = vpop.f32.mrf.mxu1  ;;  %v1050_v23 = vmul.f32 %v1906_v40, %v899_v13  ;;  %v1076_v46 = vmul.f32 %v1906_v40, %v964_v14 }
 0x121   : > { %v1352_v17 = vmax.f32 %v1302_v12, %v1327_v9  ;;  %v999_v19 = vmul.f32 %v1906_v40, %v772_v15  ;;  %v1025_v27 = vmul.f32 %v1906_v40, %v837_v16 }
 0x122   : > { %v1154_v30 = vadd.f32 %v1915_v41, %v1050_v23  ;;  %v1180_v54 = vadd.f32 %v1915_v41, %v1076_v46 }
 0x123   : > { %1377 = vst.msk [vmem:[%s1959_s7 + $0x88] sm:$0xff] %vm567_vm0, %v1352_v17  ;;  %v1103_v24 = vadd.f32 %v1915_v41, %v999_v19  ;;  %v1129_v37 = vadd.f32 %v1915_v41, %v1025_v27 }
 0x124   : > { %v1254_v44 = vmax.f32 %v1154_v30, 0.0  ;;  %v1280_v0 = vmax.f32 %v1180_v54, 0.0 }
 0x125   : > { %v1203_v26 = vmax.f32 %v1103_v24, 0.0  ;;  %v1229_v48 = vmax.f32 %v1129_v37, 0.0 }
 0x126   : > { %v1329_v51 = vmax.f32 %v1254_v44, %v1279_v42 }
 0x127   : > { %v1303_v31 = vmax.f32 %v1203_v26, %v1228_v25  ;;  %v902_v32 = vpop.f32.mrf.mxu2  ;;  %v967_v39 = vpop.f32.mrf.mxu3 }
 0x128   : > { %v774_v33 = vpop.f32.mrf.mxu0  ;;  %v839_v34 = vpop.f32.mrf.mxu1  ;;  %v1051_v45 = vmul.f32 %v1906_v40, %v902_v32  ;;  %v1077_v62 = vmul.f32 %v1906_v40, %v967_v39 }
 0x129   : > { %v1353_v35 = vmax.f32 %v1303_v31, %v1328_v29  ;;  %v1000_v38 = vmul.f32 %v1906_v40, %v774_v33  ;;  %v1026_v50 = vmul.f32 %v1906_v40, %v839_v34 }
 0x12a   : > { %v1155_v52 = vadd.f32 %v1915_v41, %v1051_v45  ;;  %v1181_v7 = vadd.f32 %v1915_v41, %v1077_v62 }
 0x12b   : > { %1378 = vst.msk [vmem:[%s1959_s7 + $0x90] sm:$0xff] %vm567_vm0, %v1353_v35  ;;  %v1104_v47 = vadd.f32 %v1915_v41, %v1000_v38  ;;  %v1130_v60 = vadd.f32 %v1915_v41, %v1026_v50 }
 0x12c   : > { %v1255_v63 = vmax.f32 %v1155_v52, 0.0  ;;  %v1281_v18 = vmax.f32 %v1181_v7, 0.0 }
 0x12d   : > { %v1204_v49 = vmax.f32 %v1104_v47, 0.0  ;;  %v1230_v4 = vmax.f32 %v1130_v60, 0.0 }
 0x12e   : > { %v1330_v9 = vmax.f32 %v1255_v63, %v1280_v0 }
 0x12f   : > { %v1304_v55 = vmax.f32 %v1204_v49, %v1229_v48  ;;  %v904_v56 = vpop.f32.mrf.mxu2  ;;  %v969_v3 = vpop.f32.mrf.mxu3 }
 0x130   : > { %v777_v57 = vpop.f32.mrf.mxu0  ;;  %v842_v58 = vpop.f32.mrf.mxu1  ;;  %v1052_v1 = vmul.f32 %v1906_v40, %v904_v56  ;;  %v1078_v21 = vmul.f32 %v1906_v40, %v969_v3 }
 0x131   : > { %v1354_v59 = vmax.f32 %v1304_v55, %v1329_v51  ;;  %v1001_v61 = vmul.f32 %v1906_v40, %v777_v57  ;;  %v1027_v6 = vmul.f32 %v1906_v40, %v842_v58 }
 0x132   : > { %v1156_v10 = vadd.f32 %v1915_v41, %v1052_v1  ;;  %v1182_v29 = vadd.f32 %v1915_v41, %v1078_v21 }
 0x133   : > { %1379 = vst.msk [vmem:[%s1959_s7 + $0x98] sm:$0xff] %vm567_vm0, %v1354_v59  ;;  %v1105_v2 = vadd.f32 %v1915_v41, %v1001_v61  ;;  %v1131_v16 = vadd.f32 %v1915_v41, %v1027_v6 }
 0x134   : > { %v1256_v19 = vmax.f32 %v1156_v10, 0.0  ;;  %v1282_v42 = vmax.f32 %v1182_v29, 0.0 }
 0x135   : > { %v1205_v5 = vmax.f32 %v1105_v2, 0.0  ;;  %v1231_v23 = vmax.f32 %v1131_v16, 0.0 }
 0x136   : > { %v1331_v27 = vmax.f32 %v1256_v19, %v1281_v18 }
 0x137   : > { %v1305_v11 = vmax.f32 %v1205_v5, %v1230_v4  ;;  %v907_v12 = vpop.f32.mrf.mxu2  ;;  %v972_v26 = vpop.f32.mrf.mxu3 }
 0x138   : > { %v779_v13 = vpop.f32.mrf.mxu0  ;;  %v844_v14 = vpop.f32.mrf.mxu1  ;;  %v1053_v20 = vmul.f32 %v1906_v40, %v907_v12  ;;  %v1079_v38 = vmul.f32 %v1906_v40, %v972_v26 }
 0x139   : > { %v1355_v15 = vmax.f32 %v1305_v11, %v1330_v9  ;;  %v1002_v17 = vmul.f32 %v1906_v40, %v779_v13  ;;  %v1028_v25 = vmul.f32 %v1906_v40, %v844_v14 }
 0x13a   : > { %v1157_v28 = vadd.f32 %v1915_v41, %v1053_v20  ;;  %v1183_v49 = vadd.f32 %v1915_v41, %v1079_v38  ;;  %v981_v20 = vmul.f32 %v1906_v40, %v1899_v36 }
 0x13b   : > { %1380 = vst.msk [vmem:[%s1959_s7 + $0xa0] sm:$0xff] %vm567_vm0, %v1355_v15  ;;  %v1106_v22 = vadd.f32 %v1915_v41, %v1002_v17  ;;  %v1132_v35 = vadd.f32 %v1915_v41, %v1028_v25 }
 0x13c   : > { %v1257_v39 = vmax.f32 %v1157_v28, 0.0  ;;  %v1283_v61 = vmax.f32 %v1183_v49, 0.0  ;;  %v1085_v28 = vadd.f32 %v1915_v41, %v981_v20 }
 0x13d   : > { %v1206_v24 = vmax.f32 %v1106_v22, 0.0  ;;  %v1232_v46 = vmax.f32 %v1132_v35, 0.0 }
 0x13e   : > { %v1332_v50 = vmax.f32 %v1257_v39, %v1282_v42  ;;  %v1185_v42 = vmax.f32 %v1085_v28, 0.0 }
 0x13f   : > { %v1306_v30 = vmax.f32 %v1206_v24, %v1231_v23  ;;  %v909_v31 = vpop.f32.mrf.mxu2  ;;  %v974_v55 = vpop.f32.mrf.mxu3 }
 0x140   : > { %v782_v32 = vpop.f32.mrf.mxu0  ;;  %v847_v33 = vpop.f32.mrf.mxu1  ;;  %v1054_v44 = vmul.f32 %v1906_v40, %v909_v31  ;;  %v1080_v0 = vmul.f32 %v1906_v40, %v974_v55 }
 0x141   : > { %v1356_v34 = vmax.f32 %v1306_v30, %v1331_v27  ;;  %v1003_v37 = vmul.f32 %v1906_v40, %v782_v32  ;;  %v1029_v48 = vmul.f32 %v1906_v40, %v847_v33 }
 0x142   : > { %v1158_v51 = vadd.f32 %v1915_v41, %v1054_v44  ;;  %v1184_v7 = vadd.f32 %v1915_v41, %v1080_v0  ;;  %v1776_v44 = vld [vmem:[%s2219_s2] ss:$0 sm:$0xff] }
 0x143   : > { %1381 = vst.msk [vmem:[%s1959_s7 + $0xa8] sm:$0xff] %vm567_vm0, %v1356_v34  ;;  %v1107_v45 = vadd.f32 %v1915_v41, %v1003_v37  ;;  %v1133_v59 = vadd.f32 %v1915_v41, %v1029_v48 }
 0x144   : > { %v1258_v62 = vmax.f32 %v1158_v51, 0.0  ;;  %v1284_v17 = vmax.f32 %v1184_v7, 0.0 }
 0x145   : > { %v1207_v47 = vmax.f32 %v1107_v45, 0.0  ;;  %v1233_v2 = vmax.f32 %v1133_v59, 0.0  ;;  %v1033_v45 = vmul.f32 %v1776_v44, %v1918_v43 }
 0x146   : > { %v1333_v5 = vmax.f32 %v1258_v62, %v1283_v61 }
 0x147   : > { %v1307_v52 = vmax.f32 %v1207_v47, %v1232_v46  ;;  %v912_v54 = vpop.f32.mrf.mxu2 }
 0x148   : > { %v784_v56 = vpop.f32.mrf.mxu0  ;;  %v849_v57 = vpop.f32.mrf.mxu1  ;;  %v1055_v63 = vmul.f32 %v1906_v40, %v912_v54 }
 0x149   : > { %v1357_v58 = vmax.f32 %v1307_v52, %v1332_v50  ;;  %v1004_v60 = vmul.f32 %v1906_v40, %v784_v56  ;;  %v1030_v4 = vmul.f32 %v1906_v40, %v849_v57 }
 0x14a   : > { %v1159_v6 = vadd.f32 %v1915_v41, %v1055_v63 }
 0x14b   : > { %1382 = vst.msk [vmem:[%s1959_s7 + $0xb0] sm:$0xff] %vm567_vm0, %v1357_v58  ;;  %v1108_v1 = vadd.f32 %v1915_v41, %v1004_v60  ;;  %v1134_v14 = vadd.f32 %v1915_v41, %v1030_v4 }
 0x14c   : > { %v1259_v16 = vmax.f32 %v1159_v6, 0.0 }
 0x14d   : > { %v1208_v3 = vmax.f32 %v1108_v1, 0.0  ;;  %v1234_v21 = vmax.f32 %v1134_v14, 0.0 }
 0x14e   : > { %v1334_v24 = vmax.f32 %v1259_v16, %v1284_v17 }
 0x14f   : > { %v1308_v9 = vmax.f32 %v1208_v3, %v1233_v2  ;;  %v914_v10 = vpop.f32.mrf.mxu2 }
 0x150   : > { %v787_v11 = vpop.f32.mrf.mxu0  ;;  %v852_v12 = vpop.f32.mrf.mxu1  ;;  %v1056_v22 = vmul.f32 %v1906_v40, %v914_v10 }
 0x151   : > { %v1358_v13 = vmax.f32 %v1308_v9, %v1333_v5  ;;  %v1005_v15 = vmul.f32 %v1906_v40, %v787_v11  ;;  %v1031_v19 = vmul.f32 %v1906_v40, %v852_v12 }
 0x152   : > { %v1160_v32 = vadd.f32 %v1915_v41, %v1056_v22 }
 0x153   : > { %1383 = vst.msk [vmem:[%s1959_s7 + $0xb8] sm:$0xff] %vm567_vm0, %v1358_v13  ;;  %v1109_v18 = vadd.f32 %v1915_v41, %v1005_v15  ;;  %v1135_v26 = vadd.f32 %v1915_v41, %v1031_v19 }
 0x154   : > { %v1260_v46 = vmax.f32 %v1160_v32, 0.0 }
 0x155   : > { %v1209_v23 = vmax.f32 %v1109_v18, 0.0  ;;  %v1235_v37 = vmax.f32 %v1135_v26, 0.0 }
 0x157   : > { %v1309_v25 = vmax.f32 %v1209_v23, %v1234_v21  ;;  %v917_v27 = vpop.f32.mrf.mxu2  ;;  %v1310_v49 = vmax.f32 %v1235_v37, %v1260_v46 }
 0x158   : > { %v1057_v29 = vmul.f32 %v1906_v40, %v917_v27  ;;  %v789_v30 = vpop.f32.mrf.mxu0  ;;  %v854_v31 = vpop.f32.mrf.mxu1 }
 0x159   : > { %v1359_v33 = vmax.f32 %v1309_v25, %v1334_v24  ;;  %v1006_v36 = vmul.f32 %v1906_v40, %v789_v30  ;;  %v1032_v34 = vmul.f32 %v1906_v40, %v854_v31 }
 0x15a   : > { %v1161_v35 = vadd.f32 %v1915_v41, %v1057_v29 }
 0x15b   : > { %1384 = vst.msk [vmem:[%s1959_s7 + $0xc0] sm:$0xff] %vm567_vm0, %v1359_v33  ;;  %v1110_v38 = vadd.f32 %v1915_v41, %v1006_v36  ;;  %v1136_v39 = vadd.f32 %v1915_v41, %v1032_v34  ;;  %v1777_v41 = vld [vmem:[%s2220_s3] ss:$0 sm:$0xff] }
 0x15c   : > { %v1261_v40 = vmax.f32 %v1161_v35, 0.0  ;;  %v1137_v54 = vadd.f32 %v1777_v41, %v1033_v45 }
 0x15d   : > { %v1210_v47 = vmax.f32 %v1110_v38, 0.0  ;;  %v1236_v48 = vmax.f32 %v1136_v39, 0.0 }
 0x15e   : > { %v1237_v58 = vmax.f32 %v1137_v54, 0.0 }
 0x15f   : > { %v1285_v50 = vmax.f32 %v1185_v42, %v1210_v47  ;;  %v1311_v51 = vmax.f32 %v1236_v48, %v1261_v40  ;;  %v919_v52 = vpop.f32.mrf.mxu2 }
 0x160   : > { %v1058_v55 = vmul.f32 %v1776_v44, %v919_v52 }
 0x161   : > { %v1335_v56 = vmax.f32 %v1285_v50, %v1310_v49  ;;  %v1336_v57 = vmax.f32 %v1924_v53, %v1311_v51 }
 0x162   : > { %v1162_v43 = vadd.f32 %v1777_v41, %v1058_v55 }
 0x163   : > { %1360 = vst.msk [vmem:[%s1959_s7] sm:$0xff] %vm567_vm0, %v1335_v56 }
 0x164   : > { %1361 = vst.msk [vmem:[%s1959_s7 + $0x8] sm:$0xff] %vm567_vm0, %v1336_v57  ;;  %v1262_v59 = vmax.f32 %v1162_v43, 0.0 }
 0x166   : > { %v1312_v60 = vmax.f32 %v1237_v58, %v1262_v59 }
 0x168   : > { %v1337_v61 = vmax.f32 %v1943_v8, %v1312_v60 }
 0x16a   : > { %1362 = vst.msk [vmem:[%s1959_s7 + $0x10] sm:$0xff] %vm567_vm0, %v1337_v61 }
 0x16b PF: > { %s14_s15 = sadd.s32 1, %s1784_s15  }
 0x16c   : > { %p11_p5 = scmp.ge.s32.totalorder %s14_s15, 4  }
 0x16e   :  { %13 = sbr.rel (!%p11_p5) target bundleno = 1 (0x1), region = 66 }

// kernel: cnn_forward.3
= control target key start
LH: loop header
LB: loop body
LE: loop exit
PB: predicated region body
PF: predicated region fallthrough
CT: control target
= control target key end

     0   :  { %s1689_s0 = inlined_call_operand.vmem [shape: f32[2,6272], index: 0, kind: input, shape index: {}]   ;;  %s1690_s1 = inlined_call_operand.vmem [shape: f32[10,6272], index: 1, kind: input, shape index: {}]   ;;  %s1691_s2 = inlined_call_operand.vmem [shape: f32[1,10], index: 2, kind: input, shape index: {}]   ;;  %s1692_s3 = inlined_call_operand.hbm [shape: f32[2,10], index: 3, kind: output, shape index: {}]  }
   0x1   :  { %v79_v0 = vld [vmem:[%s1690_s1 + $0x198] sm:$0x3]  ;;  %v77_v1 = vld [vmem:[%s1690_s1 + $0x188] sm:$0x3]  ;;  %v80_v2 = vld [vmem:[%s1690_s1 + $0x1a0] sm:$0x3] }
   0x2   :  { %309 = vmatpush.xpose.msra.mxu2 %v79_v0  ;;  %269 = vmatpush.xpose.msra.mxu0 %v77_v1  ;;  %v78_v3 = vld [vmem:[%s1690_s1 + $0x190] sm:$0x3]  ;;  %v28_v5 = vld [vmem:[%s1690_s1] sm:$0xff]  ;;  %v31_v7 = vld [vmem:[%s1690_s1 + $0x18] sm:$0xff] }
   0x3   :  { %329 = vmatpush.xpose.msra.mxu3 %v80_v2  ;;  %289 = vmatpush.xpose.msra.mxu1 %v78_v3  ;;  %v30_v4 = vld [vmem:[%s1690_s1 + $0x10] sm:$0xff]  ;;  %v15_v6 = vld [vmem:[%s1689_s0] sm:$0xff]  ;;  %v83_v8 = vld [vmem:[%s1690_s1 + $0x1b8] sm:$0x3] }
   0x4   :  { %143 = vst [vmem:[#allocation1] ss:$4 sm:$0xff] %v15_v6  ;;  %v29_v9 = vld [vmem:[%s1690_s1 + $0x8] sm:$0xff]  ;;  %v84_v11 = vld [vmem:[%s1690_s1 + $0x1c0] sm:$0x3]  ;;  %v34_v14 = vld [vmem:[%s1690_s1 + $0x30] sm:$0xff] }
   0x5   :  { %v81_v10 = vld [vmem:[%s1690_s1 + $0x1a8] sm:$0x3]  ;;  %v82_v12 = vld [vmem:[%s1690_s1 + $0x1b0] sm:$0x3]  ;;  %v32_v16 = vld [vmem:[%s1690_s1 + $0x20] sm:$0xff] }
   0x6   :  { %310 = vmatpush.xpose.msra.mxu2 %v30_v4  ;;  %270 = vmatpush.xpose.msra.mxu0 %v28_v5  ;;  %v16_v13 = vld [vmem:[%s1689_s0 + $0x8] sm:$0xff]  ;;  %v17_v15 = vld [vmem:[%s1689_s0 + $0x10] sm:$0xff]  ;;  %v35_v17 = vld [vmem:[%s1690_s1 + $0x38] sm:$0xff] }
   0x7   :  { %330 = vmatpush.xpose.msra.mxu3 %v31_v7  ;;  %290 = vmatpush.xpose.msra.mxu1 %v29_v9  ;;  %145 = vst [vmem:[#allocation1 + $0x20] ss:$4 sm:$0xff] %v16_v13  ;;  %v33_v18 = vld [vmem:[%s1690_s1 + $0x28] sm:$0xff]  ;;  %v87_v19 = vld [vmem:[%s1690_s1 + $0x1d8] sm:$0x3]  ;;  %v38_v28 = vld [vmem:[%s1690_s1 + $0x50] sm:$0xff] }
   0x8   :  { %v85_v24 = vld [vmem:[%s1690_s1 + $0x1c8] sm:$0x3]  ;;  %v88_v25 = vld [vmem:[%s1690_s1 + $0x1e0] sm:$0x3]  ;;  %v18_v26 = vld [vmem:[%s1689_s0 + $0x18] sm:$0xff] }
   0x9   :  { %v86_v27 = vld [vmem:[%s1690_s1 + $0x1d0] sm:$0x3]  ;;  %v36_v33 = vld [vmem:[%s1690_s1 + $0x40] sm:$0xff]  ;;  %v39_v34 = vld [vmem:[%s1690_s1 + $0x58] sm:$0xff] }
   0xa   :  { %389 = vmatpush.xpose.msrb.mxu2 %v83_v8  ;;  %349 = vmatpush.xpose.msrb.mxu0 %v81_v10  ;;  %v37_v35 = vld [vmem:[%s1690_s1 + $0x48] sm:$0xff]  ;;  %v91_v36 = vld [vmem:[%s1690_s1 + $0x1f8] sm:$0x3]  ;;  %v92_v38 = vld [vmem:[%s1690_s1 + $0x200] sm:$0x3] }
   0xb   :  { %409 = vmatpush.xpose.msrb.mxu3 %v84_v11  ;;  %369 = vmatpush.xpose.msrb.mxu1 %v82_v12  ;;  %v148_v20 = vld.sshfl [vmem:[#allocation1 + $0x10] sm:$0xff pattern:$0x73625140]  ;;  %v146_v21 = vld.sshfl [vmem:[#allocation1] sm:$0xff pattern:$0x73625140] }
   0xc   :  { %311 = vmatmul.f32.vlgmr.msra.gmra.mxu2 %v148_v20  ;;  %271 = vmatmul.f32.vlgmr.msra.gmra.mxu0 %v146_v21  ;;  %v149_v22 = vld.sshfl [vmem:[#allocation1 + $0x18] sm:$0xff pattern:$0x73625140]  ;;  %v147_v23 = vld.sshfl [vmem:[#allocation1 + $0x8] sm:$0xff pattern:$0x73625140] }
   0xd   :  { %331 = vmatmul.f32.vlgmr.msra.gmra.mxu3 %v149_v22  ;;  %154 = vst [vmem:[#allocation1] ss:$4 sm:$0xff] %v17_v15  ;;  %291 = vmatmul.f32.vlgmr.msra.gmra.mxu1 %v147_v23  ;;  %v89_v37 = vld [vmem:[%s1690_s1 + $0x1e8] sm:$0x3]  ;;  %v19_v39 = vld [vmem:[%s1689_s0 + $0x20] sm:$0xff]  ;;  %v42_v45 = vld [vmem:[%s1690_s1 + $0x70] sm:$0xff] }
   0xe   :  { %390 = vmatpush.xpose.msrb.mxu2 %v34_v14  ;;  %350 = vmatpush.xpose.msrb.mxu0 %v32_v16  ;;  %v152_v29 = vld.sshfl [vmem:[#allocation1 + $0x30] sm:$0xff pattern:$0x73625140]  ;;  %v150_v30 = vld.sshfl [vmem:[#allocation1 + $0x20] sm:$0xff pattern:$0x73625140] }
   0xf   :  { %410 = vmatpush.xpose.msrb.mxu3 %v35_v17  ;;  %370 = vmatpush.xpose.msrb.mxu1 %v33_v18  ;;  %v153_v31 = vld.sshfl [vmem:[#allocation1 + $0x38] sm:$0xff pattern:$0x73625140]  ;;  %v151_v32 = vld.sshfl [vmem:[#allocation1 + $0x28] sm:$0xff pattern:$0x73625140] }
  0x10   :  { %155 = vst [vmem:[#allocation1 + $0x20] ss:$4 sm:$0xff] %v18_v26  ;;  %v90_v44 = vld [vmem:[%s1690_s1 + $0x1f0] sm:$0x3]  ;;  %v20_v46 = vld [vmem:[%s1689_s0 + $0x28] sm:$0xff]  ;;  %v40_v51 = vld [vmem:[%s1690_s1 + $0x60] sm:$0xff] }
  0x11   :  { %v43_v52 = vld [vmem:[%s1690_s1 + $0x78] sm:$0xff]  ;;  %v41_v53 = vld [vmem:[%s1690_s1 + $0x68] sm:$0xff]  ;;  %v96_v56 = vld [vmem:[%s1690_s1 + $0x220] sm:$0x3] }
  0x12   :  { %469 = vmatpush.xpose.msra.mxu2 %v87_v19  ;;  %429 = vmatpush.xpose.msra.mxu0 %v85_v24  ;;  %v95_v54 = vld [vmem:[%s1690_s1 + $0x218] sm:$0x3]  ;;  %v93_v55 = vld [vmem:[%s1690_s1 + $0x208] sm:$0x3]  ;;  %v94_v57 = vld [vmem:[%s1690_s1 + $0x210] sm:$0x3] }
  0x13   :  { %489 = vmatpush.xpose.msra.mxu3 %v88_v25  ;;  %449 = vmatpush.xpose.msra.mxu1 %v86_v27  ;;  %v21_v62 = vld [vmem:[%s1689_s0 + $0x30] sm:$0xff]  ;;  %v44_v0 = vld [vmem:[%s1690_s1 + $0x80] sm:$0xff]  ;;  %v47_v1 = vld [vmem:[%s1690_s1 + $0x98] sm:$0xff] }
  0x14   :  { %391 = vmatmul.f32.vlgmr.msrb.gmra.mxu2 %v152_v29  ;;  %351 = vmatmul.f32.vlgmr.msrb.gmra.mxu0 %v150_v30  ;;  %v158_v40 = vld.sshfl [vmem:[#allocation1 + $0x10] sm:$0xff pattern:$0x73625140]  ;;  %v156_v41 = vld.sshfl [vmem:[#allocation1] sm:$0xff pattern:$0x73625140] }
  0x15   :  { %411 = vmatmul.f32.vlgmr.msrb.gmra.mxu3 %v153_v31  ;;  %371 = vmatmul.f32.vlgmr.msrb.gmra.mxu1 %v151_v32  ;;  %v159_v42 = vld.sshfl [vmem:[#allocation1 + $0x18] sm:$0xff pattern:$0x73625140]  ;;  %v157_v43 = vld.sshfl [vmem:[#allocation1 + $0x8] sm:$0xff pattern:$0x73625140] }
  0x16   :  { %470 = vmatpush.xpose.msra.mxu2 %v38_v28  ;;  %430 = vmatpush.xpose.msra.mxu0 %v36_v33  ;;  %164 = vst [vmem:[#allocation1] ss:$4 sm:$0xff] %v19_v39  ;;  %v46_v63 = vld [vmem:[%s1690_s1 + $0x90] sm:$0xff]  ;;  %v99_v2 = vld [vmem:[%s1690_s1 + $0x238] sm:$0x3]  ;;  %v45_v3 = vld [vmem:[%s1690_s1 + $0x88] sm:$0xff] }
  0x17   :  { %490 = vmatpush.xpose.msra.mxu3 %v39_v34  ;;  %450 = vmatpush.xpose.msra.mxu1 %v37_v35  ;;  %v162_v47 = vld.sshfl [vmem:[#allocation1 + $0x30] sm:$0xff pattern:$0x73625140]  ;;  %v160_v48 = vld.sshfl [vmem:[#allocation1 + $0x20] sm:$0xff pattern:$0x73625140] }
  0x18   :  { %v163_v49 = vld.sshfl [vmem:[#allocation1 + $0x38] sm:$0xff pattern:$0x73625140]  ;;  %v161_v50 = vld.sshfl [vmem:[#allocation1 + $0x28] sm:$0xff pattern:$0x73625140] }
  0x19   :  { %165 = vst [vmem:[#allocation1 + $0x20] ss:$4 sm:$0xff] %v20_v46  ;;  %v97_v4 = vld [vmem:[%s1690_s1 + $0x228] sm:$0x3]  ;;  %v100_v8 = vld [vmem:[%s1690_s1 + $0x240] sm:$0x3] }
  0x1a   :  { %549 = vmatpush.xpose.msrb.mxu2 %v91_v36  ;;  %509 = vmatpush.xpose.msrb.mxu0 %v89_v37  ;;  %v22_v10 = vld [vmem:[%s1689_s0 + $0x38] sm:$0xff]  ;;  %v98_v11 = vld [vmem:[%s1690_s1 + $0x230] sm:$0x3]  ;;  %v23_v17 = vld [vmem:[%s1689_s0 + $0x40] sm:$0xff] }
  0x1b   :  { %569 = vmatpush.xpose.msrb.mxu3 %v92_v38  ;;  %529 = vmatpush.xpose.msrb.mxu1 %v90_v44  ;;  %v50_v12 = vld [vmem:[%s1690_s1 + $0xb0] sm:$0xff]  ;;  %v48_v18 = vld [vmem:[%s1690_s1 + $0xa0] sm:$0xff]  ;;  %v51_v19 = vld [vmem:[%s1690_s1 + $0xb8] sm:$0xff] }
  0x1c   :  { %471 = vmatmul.f32.vlgmr.msra.gmra.mxu2 %v158_v40  ;;  %431 = vmatmul.f32.vlgmr.msra.gmra.mxu0 %v156_v41 }
  0x1d   :  { %491 = vmatmul.f32.vlgmr.msra.gmra.mxu3 %v159_v42  ;;  %451 = vmatmul.f32.vlgmr.msra.gmra.mxu1 %v157_v43  ;;  %v168_v58 = vld.sshfl [vmem:[#allocation1 + $0x10] sm:$0xff pattern:$0x73625140]  ;;  %v166_v59 = vld.sshfl [vmem:[#allocation1] sm:$0xff pattern:$0x73625140] }
  0x1e   :  { %550 = vmatpush.xpose.msrb.mxu2 %v42_v45  ;;  %510 = vmatpush.xpose.msrb.mxu0 %v40_v51  ;;  %v169_v60 = vld.sshfl [vmem:[#allocation1 + $0x18] sm:$0xff pattern:$0x73625140]  ;;  %v167_v61 = vld.sshfl [vmem:[#allocation1 + $0x8] sm:$0xff pattern:$0x73625140] }
  0x1f   :  { %570 = vmatpush.xpose.msrb.mxu3 %v43_v52  ;;  %530 = vmatpush.xpose.msrb.mxu1 %v41_v53  ;;  %174 = vst [vmem:[#allocation1] ss:$4 sm:$0xff] %v21_v62 }
  0x20   :  { %v172_v5 = vld.sshfl [vmem:[#allocation1 + $0x30] sm:$0xff pattern:$0x73625140]  ;;  %v170_v6 = vld.sshfl [vmem:[#allocation1 + $0x20] sm:$0xff pattern:$0x73625140] }
  0x21   :  { %v173_v7 = vld.sshfl [vmem:[#allocation1 + $0x38] sm:$0xff pattern:$0x73625140]  ;;  %v171_v9 = vld.sshfl [vmem:[#allocation1 + $0x28] sm:$0xff pattern:$0x73625140] }
  0x22   :  { %629 = vmatpush.xpose.msra.mxu2 %v95_v54  ;;  %589 = vmatpush.xpose.msra.mxu0 %v93_v55  ;;  %175 = vst [vmem:[#allocation1 + $0x20] ss:$4 sm:$0xff] %v22_v10 }
  0x23   :  { %649 = vmatpush.xpose.msra.mxu3 %v96_v56  ;;  %609 = vmatpush.xpose.msra.mxu1 %v94_v57 }
  0x24   :  { %551 = vmatmul.f32.vlgmr.msrb.gmra.mxu2 %v162_v47  ;;  %511 = vmatmul.f32.vlgmr.msrb.gmra.mxu0 %v160_v48 }
  0x25   :  { %571 = vmatmul.f32.vlgmr.msrb.gmra.mxu3 %v163_v49  ;;  %531 = vmatmul.f32.vlgmr.msrb.gmra.mxu1 %v161_v50 }
  0x26   :  { %630 = vmatpush.xpose.msra.mxu2 %v46_v63  ;;  %590 = vmatpush.xpose.msra.mxu0 %v44_v0  ;;  %v1461_v13 = vld.sshfl [vmem:[#allocation1 + $0x10] sm:$0xff pattern:$0x73625140]  ;;  %v1463_v14 = vld.sshfl [vmem:[#allocation1] sm:$0xff pattern:$0x73625140] }
  0x27   :  { %650 = vmatpush.xpose.msra.mxu3 %v47_v1  ;;  %610 = vmatpush.xpose.msra.mxu1 %v45_v3  ;;  %v1465_v15 = vld.sshfl [vmem:[#allocation1 + $0x18] sm:$0xff pattern:$0x73625140]  ;;  %v1467_v16 = vld.sshfl [vmem:[#allocation1 + $0x8] sm:$0xff pattern:$0x73625140] }
  0x28   :  { %184 = vst [vmem:[#allocation1] ss:$4 sm:$0xff] %v23_v17 }
  0x2a   :  { %709 = vmatpush.xpose.msrb.mxu2 %v99_v2  ;;  %669 = vmatpush.xpose.msrb.mxu0 %v97_v4 }
  0x2b   :  { %729 = vmatpush.xpose.msrb.mxu3 %v100_v8  ;;  %689 = vmatpush.xpose.msrb.mxu1 %v98_v11 }
  0x2e   :  { %710 = vmatpush.xpose.msrb.mxu2 %v50_v12 }
  0x2f   :  { %8 = vsyncpa [#allocation3], 0  ;;  %631 = vmatmul.f32.vlgmr.msra.gmra.mxu2 %v168_v58  ;;  %591 = vmatmul.f32.vlgmr.msra.gmra.mxu0 %v166_v59  ;;  %v49_v20 = vld [vmem:[%s1690_s1 + $0xa8] sm:$0xff]  ;;  %v103_v21 = vld [vmem:[%s1690_s1 + $0x258] sm:$0x3]  ;;  %s1244_s20 = sshll.u32 %s1692_s3, 4  ;;  %s1245_s20 = int_to_ptr.hbm [resolvable:$true] %s1244_s20 }
  0x30   :  { %v101_v22 = vld [vmem:[%s1690_s1 + $0x248] sm:$0x3]  ;;  %651 = vmatmul.f32.vlgmr.msra.gmra.mxu3 %v169_v60  ;;  %611 = vmatmul.f32.vlgmr.msra.gmra.mxu1 %v167_v61  ;;  %v104_v23 = vld [vmem:[%s1690_s1 + $0x260] sm:$0x3]  ;;  %v102_v24 = vld [vmem:[%s1690_s1 + $0x250] sm:$0x3] }
  0x31   :  { %v24_v25 = vld [vmem:[%s1689_s0 + $0x48] sm:$0xff]  ;;  %670 = vmatpush.xpose.msrb.mxu0 %v48_v18  ;;  %730 = vmatpush.xpose.msrb.mxu3 %v51_v19  ;;  %v1496_v26 = vld.sshfl [vmem:[#allocation1 + $0x30] sm:$0xff pattern:$0x73625140]  ;;  %v52_v31 = vld [vmem:[%s1690_s1 + $0xc0] sm:$0xff]  ;;  %vm1235_vm0 = vcmask 74752  }
  0x32   :  { %v1498_v27 = vld.sshfl [vmem:[#allocation1 + $0x20] sm:$0xff pattern:$0x73625140]  ;;  %690 = vmatpush.xpose.msrb.mxu1 %v49_v20  ;;  %789 = vmatpush.xpose.msra.mxu2 %v103_v21  ;;  %v1500_v28 = vld.sshfl [vmem:[#allocation1 + $0x38] sm:$0xff pattern:$0x73625140] }
  0x33   :  { %v1502_v29 = vld.sshfl [vmem:[#allocation1 + $0x28] sm:$0xff pattern:$0x73625140]  ;;  %v54_v30 = vld [vmem:[%s1690_s1 + $0xd0] sm:$0xff]  ;;  %v55_v32 = vld [vmem:[%s1690_s1 + $0xd8] sm:$0xff] }
  0x34   :  { %185 = vst [vmem:[#allocation1 + $0x20] ss:$4 sm:$0xff] %v24_v25  ;;  %v107_v33 = vld [vmem:[%s1690_s1 + $0x278] sm:$0x3]  ;;  %v53_v34 = vld [vmem:[%s1690_s1 + $0xc8] sm:$0xff]  ;;  %v25_v39 = vld [vmem:[%s1689_s0 + $0x50] sm:$0xff] }
  0x35   :  { %749 = vmatpush.xpose.msra.mxu0 %v101_v22  ;;  %809 = vmatpush.xpose.msra.mxu3 %v104_v23  ;;  %v105_v35 = vld [vmem:[%s1690_s1 + $0x268] sm:$0x3]  ;;  %v1522_v36 = vld.sshfl [vmem:[#allocation1 + $0x10] sm:$0xff pattern:$0x73625140]  ;;  %v56_v44 = vld [vmem:[%s1690_s1 + $0xe0] sm:$0xff] }
  0x36   :  { %769 = vmatpush.xpose.msra.mxu1 %v102_v24  ;;  %790 = vmatpush.xpose.msra.mxu2 %v54_v30  ;;  %v108_v37 = vld [vmem:[%s1690_s1 + $0x280] sm:$0x3]  ;;  %v1532_v40 = vld.sshfl [vmem:[#allocation1 + $0x18] sm:$0xff pattern:$0x73625140]  ;;  %v58_v43 = vld [vmem:[%s1690_s1 + $0xf0] sm:$0xff] }
  0x37   :  { %711 = vmatmul.f32.vlgmr.msrb.gmra.mxu2 %v172_v5  ;;  %671 = vmatmul.f32.vlgmr.msrb.gmra.mxu0 %v170_v6  ;;  %v1527_v38 = vld.sshfl [vmem:[#allocation1] sm:$0xff pattern:$0x73625140]  ;;  %v1534_v41 = vld.sshfl [vmem:[#allocation1 + $0x8] sm:$0xff pattern:$0x73625140] }
  0x38   :  { %731 = vmatmul.f32.vlgmr.msrb.gmra.mxu3 %v173_v7  ;;  %691 = vmatmul.f32.vlgmr.msrb.gmra.mxu1 %v171_v9  ;;  %v106_v42 = vld [vmem:[%s1690_s1 + $0x270] sm:$0x3]  ;;  %194 = vst [vmem:[#allocation1] ss:$4 sm:$0xff] %v25_v39  ;;  %v59_v48 = vld [vmem:[%s1690_s1 + $0xf8] sm:$0xff]  ;;  %v57_v51 = vld [vmem:[%s1690_s1 + $0xe8] sm:$0xff] }
  0x39   :  { %750 = vmatpush.xpose.msra.mxu0 %v52_v31  ;;  %810 = vmatpush.xpose.msra.mxu3 %v55_v32  ;;  %v26_v50 = vld [vmem:[%s1689_s0 + $0x58] sm:$0xff]  ;;  %v109_v53 = vld [vmem:[%s1690_s1 + $0x288] sm:$0x3]  ;;  %v112_v54 = vld [vmem:[%s1690_s1 + $0x2a0] sm:$0x3] }
  0x3a   :  { %770 = vmatpush.xpose.msra.mxu1 %v53_v34  ;;  %869 = vmatpush.xpose.msrb.mxu2 %v107_v33  ;;  %v111_v52 = vld [vmem:[%s1690_s1 + $0x298] sm:$0x3]  ;;  %v110_v55 = vld [vmem:[%s1690_s1 + $0x290] sm:$0x3]  ;;  %v60_v57 = vld [vmem:[%s1690_s1 + $0x100] sm:$0xff] }
  0x3b   :  { %v1545_v45 = vld.sshfl [vmem:[#allocation1 + $0x30] sm:$0xff pattern:$0x73625140]  ;;  %v1547_v46 = vld.sshfl [vmem:[#allocation1 + $0x20] sm:$0xff pattern:$0x73625140] }
  0x3c   :  { %v1549_v47 = vld.sshfl [vmem:[#allocation1 + $0x38] sm:$0xff pattern:$0x73625140]  ;;  %v1554_v49 = vld.sshfl [vmem:[#allocation1 + $0x28] sm:$0xff pattern:$0x73625140] }
  0x3d   :  { %829 = vmatpush.xpose.msrb.mxu0 %v105_v35  ;;  %889 = vmatpush.xpose.msrb.mxu3 %v108_v37  ;;  %195 = vst [vmem:[#allocation1 + $0x20] ss:$4 sm:$0xff] %v26_v50  ;;  %v62_v56 = vld [vmem:[%s1690_s1 + $0x110] sm:$0xff]  ;;  %v63_v58 = vld [vmem:[%s1690_s1 + $0x118] sm:$0xff]  ;;  %v113_v60 = vld [vmem:[%s1690_s1 + $0x2a8] sm:$0x3] }
  0x3e   :  { %849 = vmatpush.xpose.msrb.mxu1 %v106_v42  ;;  %870 = vmatpush.xpose.msrb.mxu2 %v58_v43  ;;  %v115_v59 = vld [vmem:[%s1690_s1 + $0x2b8] sm:$0x3]  ;;  %v116_v61 = vld [vmem:[%s1690_s1 + $0x2c0] sm:$0x3]  ;;  %v61_v62 = vld [vmem:[%s1690_s1 + $0x108] sm:$0xff] }
  0x3f   :  { %791 = vmatmul.f32.vlgmr.msra.gmra.mxu2 %v1461_v13  ;;  %751 = vmatmul.f32.vlgmr.msra.gmra.mxu0 %v1463_v14  ;;  %v114_v63 = vld [vmem:[%s1690_s1 + $0x2b0] sm:$0x3]  ;;  %v196_v1 = vld.sshfl [vmem:[#allocation1] sm:$0xff pattern:$0x73625140]  ;;  %v67_v7 = vld [vmem:[%s1690_s1 + $0x138] sm:$0xff] }
  0x40   :  { %811 = vmatmul.f32.vlgmr.msra.gmra.mxu3 %v1465_v15  ;;  %771 = vmatmul.f32.vlgmr.msra.gmra.mxu1 %v1467_v16  ;;  %v198_v0 = vld.sshfl [vmem:[#allocation1 + $0x10] sm:$0xff pattern:$0x73625140]  ;;  %v199_v2 = vld.sshfl [vmem:[#allocation1 + $0x18] sm:$0xff pattern:$0x73625140] }
  0x41   :  { %830 = vmatpush.xpose.msrb.mxu0 %v56_v44  ;;  %890 = vmatpush.xpose.msrb.mxu3 %v59_v48  ;;  %v197_v3 = vld.sshfl [vmem:[#allocation1 + $0x8] sm:$0xff pattern:$0x73625140]  ;;  %v27_v4 = vld [vmem:[%s1689_s0 + $0x60] sm:$0x3]  ;;  %v66_v5 = vld [vmem:[%s1690_s1 + $0x130] sm:$0xff] }
  0x42   :  { %850 = vmatpush.xpose.msrb.mxu1 %v57_v51  ;;  %949 = vmatpush.xpose.msra.mxu2 %v111_v52  ;;  %204 = vst [vmem:[#allocation1] ss:$4 sm:$0xff] %v27_v4  ;;  %v64_v6 = vld [vmem:[%s1690_s1 + $0x120] sm:$0xff]  ;;  %v65_v8 = vld [vmem:[%s1690_s1 + $0x128] sm:$0xff]  ;;  %v119_v9 = vld [vmem:[%s1690_s1 + $0x2d8] sm:$0x3] }
  0x43   :  { %v117_v10 = vld [vmem:[%s1690_s1 + $0x2c8] sm:$0x3]  ;;  %v120_v11 = vld [vmem:[%s1690_s1 + $0x2e0] sm:$0x3]  ;;  %v118_v12 = vld [vmem:[%s1690_s1 + $0x2d0] sm:$0x3] }
  0x44   :  { %v70_v13 = vld [vmem:[%s1690_s1 + $0x150] sm:$0xff]  ;;  %v68_v14 = vld [vmem:[%s1690_s1 + $0x140] sm:$0xff]  ;;  %v71_v15 = vld [vmem:[%s1690_s1 + $0x158] sm:$0xff] }
  0x45   :  { %909 = vmatpush.xpose.msra.mxu0 %v109_v53  ;;  %969 = vmatpush.xpose.msra.mxu3 %v112_v54  ;;  %v69_v16 = vld [vmem:[%s1690_s1 + $0x148] sm:$0xff]  ;;  %v123_v17 = vld [vmem:[%s1690_s1 + $0x2f8] sm:$0x3]  ;;  %v124_v19 = vld [vmem:[%s1690_s1 + $0x300] sm:$0x3] }
  0x46   :  { %929 = vmatpush.xpose.msra.mxu1 %v110_v55  ;;  %950 = vmatpush.xpose.msra.mxu2 %v62_v56  ;;  %v121_v18 = vld [vmem:[%s1690_s1 + $0x2e8] sm:$0x3]  ;;  %v122_v20 = vld [vmem:[%s1690_s1 + $0x2f0] sm:$0x3]  ;;  %v72_v22 = vld [vmem:[%s1690_s1 + $0x160] sm:$0xff] }
  0x47   :  { %871 = vmatmul.f32.vlgmr.msrb.gmra.mxu2 %v1496_v26  ;;  %831 = vmatmul.f32.vlgmr.msrb.gmra.mxu0 %v1498_v27  ;;  %v74_v21 = vld [vmem:[%s1690_s1 + $0x170] sm:$0xff]  ;;  %v75_v23 = vld [vmem:[%s1690_s1 + $0x178] sm:$0xff]  ;;  %v73_v24 = vld [vmem:[%s1690_s1 + $0x168] sm:$0xff] }
  0x48   :  { %891 = vmatmul.f32.vlgmr.msrb.gmra.mxu3 %v1500_v28  ;;  %851 = vmatmul.f32.vlgmr.msrb.gmra.mxu1 %v1502_v29  ;;  %v125_v25 = vld [vmem:[%s1690_s1 + $0x308] sm:$0x3]  ;;  %v76_v26 = vld [vmem:[%s1690_s1 + $0x180] sm:$0xff]  ;;  %v202_v27 = vld.sshfl [vmem:[#allocation1 + $0x30] sm:$0xff pattern:$0x73625140] }
  0x49   :  { %910 = vmatpush.xpose.msra.mxu0 %v60_v57  ;;  %970 = vmatpush.xpose.msra.mxu3 %v63_v58  ;;  %v200_v28 = vld.sshfl [vmem:[#allocation1 + $0x20] sm:$0xff pattern:$0x73625140]  ;;  %v203_v29 = vld.sshfl [vmem:[#allocation1 + $0x38] sm:$0xff pattern:$0x73625140] }
  0x4a   :  { %930 = vmatpush.xpose.msra.mxu1 %v61_v62  ;;  %1029 = vmatpush.xpose.msrb.mxu2 %v115_v59  ;;  %v201_v30 = vld.sshfl [vmem:[#allocation1 + $0x28] sm:$0xff pattern:$0x73625140]  ;;  %v205_v31 = vld.sshfl [vmem:[#allocation1] sm:$0xff pattern:$0x73625140] }
  0x4b   :  { %v1254_v32 = vld [vmem:[%s1691_s2] ss:$0 sm:$0xff]  ;;  %s1281_s1 = smov [#allocation2]  }
  0x4c   :  { %s1242_s2 = sshll.u32 %s1281_s1, 4  ;;  %s1243_s2 = int_to_ptr.vmem [resolvable:$true] %s1242_s2 }
  0x4d   :  { %989 = vmatpush.xpose.msrb.mxu0 %v113_v60  ;;  %1049 = vmatpush.xpose.msrb.mxu3 %v116_v61 }
  0x4e   :  { %1009 = vmatpush.xpose.msrb.mxu1 %v114_v63  ;;  %1030 = vmatpush.xpose.msrb.mxu2 %v66_v5 }
  0x4f   :  { %951 = vmatmul.f32.vlgmr.msra.gmra.mxu2 %v1522_v36  ;;  %911 = vmatmul.f32.vlgmr.msra.gmra.mxu0 %v1527_v38 }
  0x50   :  { %971 = vmatmul.f32.vlgmr.msra.gmra.mxu3 %v1532_v40  ;;  %931 = vmatmul.f32.vlgmr.msra.gmra.mxu1 %v1534_v41 }
  0x51   :  { %990 = vmatpush.xpose.msrb.mxu0 %v64_v6  ;;  %1050 = vmatpush.xpose.msrb.mxu3 %v67_v7 }
  0x52   :  { %1010 = vmatpush.xpose.msrb.mxu1 %v65_v8  ;;  %1109 = vmatpush.xpose.msra.mxu2 %v119_v9 }
  0x55   :  { %1069 = vmatpush.xpose.msra.mxu0 %v117_v10  ;;  %1129 = vmatpush.xpose.msra.mxu3 %v120_v11 }
  0x56   :  { %1089 = vmatpush.xpose.msra.mxu1 %v118_v12  ;;  %1110 = vmatpush.xpose.msra.mxu2 %v70_v13 }
  0x57   :  { %1031 = vmatmul.f32.vlgmr.msrb.gmra.mxu2 %v1545_v45  ;;  %991 = vmatmul.f32.vlgmr.msrb.gmra.mxu0 %v1547_v46 }
  0x58   :  { %1051 = vmatmul.f32.vlgmr.msrb.gmra.mxu3 %v1549_v47  ;;  %1011 = vmatmul.f32.vlgmr.msrb.gmra.mxu1 %v1554_v49 }
  0x59   :  { %1070 = vmatpush.xpose.msra.mxu0 %v68_v14  ;;  %1130 = vmatpush.xpose.msra.mxu3 %v71_v15 }
  0x5a   :  { %1090 = vmatpush.xpose.msra.mxu1 %v69_v16  ;;  %1189 = vmatpush.xpose.msrb.mxu2 %v123_v17 }
  0x5d   :  { %1149 = vmatpush.xpose.msrb.mxu0 %v121_v18  ;;  %1209 = vmatpush.xpose.msrb.mxu3 %v124_v19 }
  0x5e   :  { %1169 = vmatpush.xpose.msrb.mxu1 %v122_v20  ;;  %1190 = vmatpush.xpose.msrb.mxu2 %v74_v21 }
  0x5f   :  { %1111 = vmatmul.f32.vlgmr.msra.gmra.mxu2 %v198_v0  ;;  %1071 = vmatmul.f32.vlgmr.msra.gmra.mxu0 %v196_v1 }
  0x60   :  { %1131 = vmatmul.f32.vlgmr.msra.gmra.mxu3 %v199_v2  ;;  %1091 = vmatmul.f32.vlgmr.msra.gmra.mxu1 %v197_v3 }
  0x61   :  { %1150 = vmatpush.xpose.msrb.mxu0 %v72_v22  ;;  %1210 = vmatpush.xpose.msrb.mxu3 %v75_v23 }
  0x62   :  { %1170 = vmatpush.xpose.msrb.mxu1 %v73_v24 }
  0x65   :  { %1229 = vmatpush.xpose.msra.mxu0 %v125_v25 }
  0x67   :  { %1191 = vmatmul.f32.vlgmr.msrb.gmra.mxu2 %v202_v27  ;;  %1151 = vmatmul.f32.vlgmr.msrb.gmra.mxu0 %v200_v28 }
  0x68   :  { %1211 = vmatmul.f32.vlgmr.msrb.gmra.mxu3 %v203_v29  ;;  %1171 = vmatmul.f32.vlgmr.msrb.gmra.mxu1 %v201_v30 }
  0x69   :  { %1230 = vmatpush.xpose.msra.mxu0 %v76_v26 }
  0x6f   :  { %1231 = vmatmul.f32.vlgmr.msra.gmra.mxu0 %v205_v31 }
  0x89   :  { %v272_v33 = vpop.f32.mrf.mxu0 }
  0x8a   :  { %v273_v34 = vadd.f32 %v1254_v32, %v272_v33  ;;  %v292_v35 = vpop.f32.mrf.mxu1 }
  0x8c   :  { %v293_v36 = vadd.f32 %v292_v35, %v273_v34 }
  0x8f   :  { %v312_v37 = vpop.f32.mrf.mxu2 }
  0x90   :  { %v313_v38 = vadd.f32 %v312_v37, %v293_v36  ;;  %v332_v39 = vpop.f32.mrf.mxu3 }
  0x91   :  { %v352_v40 = vpop.f32.mrf.mxu0 }
  0x92   :  { %v333_v41 = vadd.f32 %v332_v39, %v313_v38  ;;  %v372_v42 = vpop.f32.mrf.mxu1 }
  0x94   :  { %v353_v43 = vadd.f32 %v352_v40, %v333_v41 }
  0x96   :  { %v373_v44 = vadd.f32 %v372_v42, %v353_v43 }
  0x97   :  { %v392_v45 = vpop.f32.mrf.mxu2 }
  0x98   :  { %v393_v46 = vadd.f32 %v392_v45, %v373_v44  ;;  %v412_v47 = vpop.f32.mrf.mxu3 }
  0x99   :  { %v432_v48 = vpop.f32.mrf.mxu0 }
  0x9a   :  { %v413_v49 = vadd.f32 %v412_v47, %v393_v46  ;;  %v452_v50 = vpop.f32.mrf.mxu1 }
  0x9c   :  { %v433_v51 = vadd.f32 %v432_v48, %v413_v49 }
  0x9e   :  { %v453_v52 = vadd.f32 %v452_v50, %v433_v51 }
  0x9f   :  { %v472_v53 = vpop.f32.mrf.mxu2 }
  0xa0   :  { %v473_v54 = vadd.f32 %v472_v53, %v453_v52  ;;  %v492_v55 = vpop.f32.mrf.mxu3 }
  0xa1   :  { %v512_v56 = vpop.f32.mrf.mxu0 }
  0xa2   :  { %v493_v57 = vadd.f32 %v492_v55, %v473_v54  ;;  %v532_v58 = vpop.f32.mrf.mxu1 }
  0xa4   :  { %v513_v59 = vadd.f32 %v512_v56, %v493_v57 }
  0xa6   :  { %v533_v60 = vadd.f32 %v532_v58, %v513_v59 }
  0xa7   :  { %v552_v61 = vpop.f32.mrf.mxu2 }
  0xa8   :  { %v553_v62 = vadd.f32 %v552_v61, %v533_v60  ;;  %v572_v63 = vpop.f32.mrf.mxu3 }
  0xaa   :  { %v573_v1 = vadd.f32 %v572_v63, %v553_v62 }
  0xac   :  { %v592_v0 = vpop.f32.mrf.mxu0 }
  0xad   :  { %v612_v2 = vpop.f32.mrf.mxu1  ;;  %v593_v3 = vadd.f32 %v592_v0, %v573_v1 }
  0xaf   :  { %v613_v4 = vadd.f32 %v612_v2, %v593_v3 }
  0xb2   :  { %v632_v5 = vpop.f32.mrf.mxu2 }
  0xb3   :  { %v633_v6 = vadd.f32 %v632_v5, %v613_v4  ;;  %v652_v7 = vpop.f32.mrf.mxu3 }
  0xb4   :  { %v672_v8 = vpop.f32.mrf.mxu0 }
  0xb5   :  { %v653_v9 = vadd.f32 %v652_v7, %v633_v6  ;;  %v692_v10 = vpop.f32.mrf.mxu1 }
  0xb7   :  { %v673_v11 = vadd.f32 %v672_v8, %v653_v9 }
  0xb9   :  { %v693_v12 = vadd.f32 %v692_v10, %v673_v11 }
  0xba   :  { %v712_v13 = vpop.f32.mrf.mxu2 }
  0xbb   :  { %v713_v14 = vadd.f32 %v712_v13, %v693_v12  ;;  %v732_v15 = vpop.f32.mrf.mxu3 }
  0xbc   :  { %v752_v16 = vpop.f32.mrf.mxu0 }
  0xbd   :  { %v733_v17 = vadd.f32 %v732_v15, %v713_v14  ;;  %v772_v18 = vpop.f32.mrf.mxu1 }
  0xbf   :  { %v753_v19 = vadd.f32 %v752_v16, %v733_v17 }
  0xc1   :  { %v773_v20 = vadd.f32 %v772_v18, %v753_v19 }
  0xc2   :  { %v792_v21 = vpop.f32.mrf.mxu2 }
  0xc3   :  { %v793_v22 = vadd.f32 %v792_v21, %v773_v20  ;;  %v812_v23 = vpop.f32.mrf.mxu3 }
  0xc4   :  { %v832_v24 = vpop.f32.mrf.mxu0 }
  0xc5   :  { %v813_v25 = vadd.f32 %v812_v23, %v793_v22  ;;  %v852_v26 = vpop.f32.mrf.mxu1 }
  0xc7   :  { %v833_v27 = vadd.f32 %v832_v24, %v813_v25 }
  0xc9   :  { %v853_v28 = vadd.f32 %v852_v26, %v833_v27 }
  0xca   :  { %v872_v29 = vpop.f32.mrf.mxu2 }
  0xcb   :  { %v873_v30 = vadd.f32 %v872_v29, %v853_v28  ;;  %v892_v31 = vpop.f32.mrf.mxu3 }
  0xcc   :  { %v912_v32 = vpop.f32.mrf.mxu0 }
  0xcd   :  { %v893_v33 = vadd.f32 %v892_v31, %v873_v30  ;;  %v932_v34 = vpop.f32.mrf.mxu1 }
  0xcf   :  { %v913_v35 = vadd.f32 %v912_v32, %v893_v33 }
  0xd1   :  { %v933_v36 = vadd.f32 %v932_v34, %v913_v35 }
  0xd2   :  { %v952_v37 = vpop.f32.mrf.mxu2 }
  0xd3   :  { %v953_v38 = vadd.f32 %v952_v37, %v933_v36  ;;  %v972_v39 = vpop.f32.mrf.mxu3 }
  0xd4   :  { %v992_v40 = vpop.f32.mrf.mxu0 }
  0xd5   :  { %v973_v41 = vadd.f32 %v972_v39, %v953_v38  ;;  %v1012_v42 = vpop.f32.mrf.mxu1 }
  0xd7   :  { %v993_v43 = vadd.f32 %v992_v40, %v973_v41 }
  0xd9   :  { %v1013_v44 = vadd.f32 %v1012_v42, %v993_v43 }
  0xda   :  { %v1032_v45 = vpop.f32.mrf.mxu2 }
  0xdb   :  { %v1033_v46 = vadd.f32 %v1032_v45, %v1013_v44  ;;  %v1052_v47 = vpop.f32.mrf.mxu3 }
  0xdc   :  { %v1072_v48 = vpop.f32.mrf.mxu0 }
  0xdd   :  { %v1053_v49 = vadd.f32 %v1052_v47, %v1033_v46  ;;  %v1092_v50 = vpop.f32.mrf.mxu1 }
  0xdf   :  { %v1073_v51 = vadd.f32 %v1072_v48, %v1053_v49 }
  0xe1   :  { %v1093_v52 = vadd.f32 %v1092_v50, %v1073_v51 }
  0xe2   :  { %v1112_v53 = vpop.f32.mrf.mxu2 }
  0xe3   :  { %v1113_v54 = vadd.f32 %v1112_v53, %v1093_v52  ;;  %v1132_v55 = vpop.f32.mrf.mxu3 }
  0xe4   :  { %v1152_v56 = vpop.f32.mrf.mxu0 }
  0xe5   :  { %v1133_v57 = vadd.f32 %v1132_v55, %v1113_v54  ;;  %v1172_v58 = vpop.f32.mrf.mxu1 }
  0xe7   :  { %v1153_v59 = vadd.f32 %v1152_v56, %v1133_v57 }
  0xe9   :  { %v1173_v60 = vadd.f32 %v1172_v58, %v1153_v59 }
  0xea   :  { %v1192_v61 = vpop.f32.mrf.mxu2 }
  0xeb   :  { %v1193_v62 = vadd.f32 %v1192_v61, %v1173_v60  ;;  %v1212_v63 = vpop.f32.mrf.mxu3 }
  0xec   :  { %v1232_v0 = vpop.f32.mrf.mxu0 }
  0xed   :  { %v1213_v1 = vadd.f32 %v1212_v63, %v1193_v62 }
  0xef   :  { %v1233_v2 = vadd.f32 %v1232_v0, %v1213_v1 }
  0xf1   :  { %1236 = vst.msk [vmem:[#allocation2] sm:$0x3] %vm1235_vm0, %v1233_v2 }
  0xf2   :  { %1247 = dma.vmem_to_hbm [thread:$0]  %s1243_s2, 32, %s1245_s20, [#allocation3]  }
  0xf3   :  { %1279 = dma.done.wait [#allocation3], 32  }
  0xf4   :  { %1280 = vsyncadd [#allocation3], 4294967264 }
  0xf5   :  { %1252 = vsyncpa [#allocation3], 1 }

</bundles_post_ra>
